<compile_context>
chip_gen: v7x
topology: tpu7x:2x2x1
jax: 0.10.0
libtpu: 0.0.40
codegen_flags: <defaults>
</compile_context>

<pallas_src>
import functools

import jax
import jax.numpy as jnp
from jax import lax
from jax.experimental import pallas as pl
from jax.experimental.pallas import tpu as pltpu


def _auto_weighted_ce_kernel(cw_ref, pred_ref, label_ref, out_ref,
                             segrev_scr, cehl_scr, *,
                             ignore_index, num_scales):
    """Per-image body.

    cw_ref:     (C,)        f32  SMEM   'auto' class weights (global pre-pass)
    pred_ref:   (1, C, H, W) f32 VMEM   logits for image n
    label_ref:  (1, H, W)    i32 VMEM   labels for image n
    out_ref:    (1, 8, 128)  f32 VMEM   per-image partial sum (lane-dense block)
    segrev_scr: (C*H, W)     bf16 VMEM  seg_rev row blocks (W-conv LHS)
    cehl_scr:   (H, 2*C*W)   bf16 VMEM  masked-CE hi|lo column blocks (H-conv RHS)
    """
    pred = pred_ref[0]            # (C, H, W) f32
    label = label_ref[0]          # (H, W)    i32
    C, H, W = pred.shape
    R = num_scales

    lab_cl = jnp.clip(label, 0, C - 1)
    valid = label != ignore_index

    # ---- log-sum-exp over classes (elementwise, f32) ----
    m = pred[0]
    for c in range(1, C):
        m = jnp.maximum(m, pred[c])
    sumexp = jnp.exp(pred[0] - m)
    for c in range(1, C):
        sumexp = sumexp + jnp.exp(pred[c] - m)
    lse = jnp.log(sumexp) + m                                   # (H, W)

    # ---- target logit + 'auto' class-weight gather (per-class selects) ----
    pred_y = jnp.zeros((H, W), jnp.float32)
    cw_y = jnp.zeros((H, W), jnp.float32)
    for c in range(C):
        mask_c = lab_cl == c
        pred_y = pred_y + jnp.where(mask_c, pred[c], 0.0)
        cw_y = cw_y + jnp.where(mask_c, cw_ref[c], 0.0)         # scalar SMEM read

    # weighted CE with ignore_index, reduction='none'
    ce = jnp.where(valid, cw_y * (lse - pred_y), 0.0)           # (H, W) f32

    # ---- build MXU operands in-place in VMEM scratch (no stack/concat copy) ----
    #  segrev_scr row block c : seg_rev_c = (lab != c)          (0/1, exact bf16)
    #  cehl_scr  col block c  : hi(mask_c * ce), block C+c : lo residual (bf16x2)
    for c in range(C):
        mask_c = lab_cl == c
        segrev_scr[pl.ds(c * H, H), :] = jnp.where(
            mask_c, 0.0, 1.0).astype(jnp.bfloat16)
        mce = jnp.where(mask_c, ce, 0.0)
        hi = mce.astype(jnp.bfloat16)
        lo = (mce - hi.astype(jnp.float32)).astype(jnp.bfloat16)
        cehl_scr[:, pl.ds(c * W, W)] = hi
        cehl_scr[:, pl.ds((C + c) * W, W)] = lo

    # ---- banded box-conv operators, all r scales concatenated (0/1 bf16) ----
    hi_i = lax.broadcasted_iota(jnp.int32, (H, H), 0)
    hj_i = lax.broadcasted_iota(jnp.int32, (H, H), 1)
    wi_i = lax.broadcasted_iota(jnp.int32, (W, W), 0)
    wj_i = lax.broadcasted_iota(jnp.int32, (W, W), 1)
    bh_stack = jnp.concatenate(
        [(jnp.abs(hi_i - hj_i) <= 2 ** i).astype(jnp.bfloat16)
         for i in range(R)], axis=0)                            # (R*H, H)
    bw_concat = jnp.concatenate(
        [(jnp.abs(wi_i - wj_i) <= 2 ** i).astype(jnp.bfloat16)
         for i in range(R)], axis=1)                            # (W, R*W)

    # ---- two MXU matmuls cover every (scale, class) pair ----
    # W-conv of seg_rev (counts <= 33, exact: 0/1 bf16 operands, f32 accum).
    b_all = jnp.dot(segrev_scr[...], bw_concat,
                    preferred_element_type=jnp.float32)         # (C*H, R*W)
    # H-conv of masked CE, bf16x2 split for f32-level accuracy.
    a_both = jnp.dot(bh_stack, cehl_scr[...],
                     preferred_element_type=jnp.float32)        # (R*H, 2*C*W)
    a_all = a_both[:, :C * W] + a_both[:, C * W:]               # (R*H, C*W)

    # ---- per-(scale, class) inner products of layout-aligned (H,W) tiles ----
    #   a_all[i*H:, c*W:] = Bh_i @ (mask_c*ce)    b_all[c*H:, i*W:] = seg_rev_c @ Bw_i
    #   <mask_c*ce, Bh_i seg_rev_c Bw_i> == sum(a_tile * b_tile)   (Bh symmetric)
    # The '-seg_rev' term of one_hot2weight vanishes at kept (mask_c) positions.
    acc = jnp.zeros((H, W), jnp.float32)
    for i in range(R):
        ksz = 2 ** (i + 1) + 1
        s_i = 1.0 / float(ksz * ksz - 1)
        blk = jnp.zeros((H, W), jnp.float32)
        for c in range(C):
            blk = blk + (a_all[i * H:(i + 1) * H, c * W:(c + 1) * W] *
                         b_all[c * H:(c + 1) * H, i * W:(i + 1) * W])
        acc = acc + s_i * blk

    # per-image sum of ce * bweight, with bweight = 1 + boundary term.
    total = jnp.sum(ce + acc)                                   # single reduction
    out_ref[0] = jnp.full((8, 128), total, dtype=jnp.float32)


def auto_weighted_ce_loss(cls_score, label, *, r=5, ignore_index=-100,
                          loss_weight=1.0):
    """cls_score: (N, C, H, W) float (NCHW, like the PyTorch module);
    label: (N, H, W) int."""
    N, C, H, W = cls_score.shape
    pred = cls_score.astype(jnp.float32)
    lab = label.astype(jnp.int32)

    # 'auto' class weights need a GLOBAL class histogram before any per-pixel
    # CE -> cheap XLA pre-pass on int labels, fed to the kernel via SMEM.
    lab_cl = jnp.clip(lab, 0, C - 1)
    counts = jnp.sum(
        (lab_cl[..., None] == jnp.arange(C, dtype=jnp.int32)).astype(jnp.float32),
        axis=(0, 1, 2))
    class_weight = (2.0 / (counts / float(N * H * W) + 1.0)).astype(jnp.float32)

    kernel = functools.partial(_auto_weighted_ce_kernel,
                               ignore_index=ignore_index, num_scales=r)
    partial_sums = pl.pallas_call(
        kernel,
        grid=(N,),
        out_shape=jax.ShapeDtypeStruct((N, 8, 128), jnp.float32),
        in_specs=[
            pl.BlockSpec(memory_space=pltpu.MemorySpace.SMEM),        # (C,) weights
            pl.BlockSpec((1, C, H, W), lambda n: (n, 0, 0, 0)),       # pred block
            pl.BlockSpec((1, H, W), lambda n: (n, 0, 0)),             # label block
        ],
        out_specs=pl.BlockSpec((1, 8, 128), lambda n: (n, 0, 0)),
        scratch_shapes=[
            pltpu.VMEM((C * H, W), jnp.bfloat16),         # seg_rev rows
            pltpu.VMEM((H, 2 * C * W), jnp.bfloat16),     # masked-CE hi|lo cols
        ],
        compiler_params=pltpu.CompilerParams(
            dimension_semantics=("parallel",)),
    )(class_weight, pred, lab)

    # reduction='mean', avg_factor=None, avg_non_ignore=False -> mean over all
    # N*H*W pixels; tiny final reduction over N partials stays in XLA.
    return loss_weight * jnp.sum(partial_sums[:, 0, 0]) / float(N * H * W)


def _reference_loss(cls_score, label, *, r=5, ignore_index=-100, loss_weight=1.0):
    """Pure-JAX reference mirroring the PyTorch semantics."""
    N, C, H, W = cls_score.shape
    lab_cl = jnp.clip(label, 0, C - 1)
    onehot = jnp.transpose(jax.nn.one_hot(lab_cl, C, dtype=jnp.float32),
                           (0, 3, 1, 2))                       # (N,C,H,W)
    class_w = 2.0 / (jnp.sum(onehot, axis=(0, 2, 3)) / (N * H * W) + 1.0)

    seg = onehot.reshape(N * C, 1, H, W)
    seg_rev = 1.0 - seg
    out = jnp.zeros((N, H, W), jnp.float32)
    for i in range(1, r + 1):
        K = 2 ** i + 1
        p = 2 ** (i - 1)
        ker = jnp.ones((1, 1, K, K), jnp.float32)
        conv = lax.conv_general_dilated(seg_rev, ker, (1, 1), [(p, p), (p, p)],
                                        dimension_numbers=('NCHW', 'OIHW', 'NCHW'))
        wi = (conv - seg_rev) / (K * K - 1)
        wi = jnp.where(seg == 0.0, 0.0, wi)
        out = out + jnp.sum(wi.reshape(N, C, H, W), axis=1)
    bweight = out + 1.0

    logp = jax.nn.log_softmax(cls_score, axis=1)
    pick = jnp.take_along_axis(logp, lab_cl[:, None, :, :], axis=1)[:, 0]
    ce = -class_w[lab_cl] * pick
    ce = jnp.where(label != ignore_index, ce, 0.0)
    return loss_weight * jnp.mean(ce * bweight)


if __name__ == "__main__":
    key = jax.random.PRNGKey(0)
    k1, k2 = jax.random.split(key)
    N, C, H, W = 2, 4, 16, 16
    cls_score = jax.random.normal(k1, (N, C, H, W), dtype=jnp.float32)
    label = jax.random.randint(k2, (N, H, W), 0, C, dtype=jnp.int32)

    loss = auto_weighted_ce_loss(cls_score, label)
    loss = jax.block_until_ready(loss)

    ref = _reference_loss(cls_score, label)
    assert jnp.allclose(loss, ref, rtol=1e-4, atol=1e-5), (float(loss), float(ref))
    print("KERNEL_OK")
</pallas_src>

<mosaic_0001>
module attributes {stable_mosaic.version = 11 : i64} {
  func.func @_auto_weighted_ce_kernel(%arg0: i32, %arg1: memref<4xf32, #tpu.memory_space<smem>>, %arg2: memref<1x4x16x16xf32, #tpu.memory_space<vmem>>, %arg3: memref<1x16x16xi32, #tpu.memory_space<vmem>>, %arg4: memref<1x8x128xf32, #tpu.memory_space<vmem>>, %arg5: memref<64x16xbf16, #tpu.memory_space<vmem>>, %arg6: memref<16x128xbf16, #tpu.memory_space<vmem>>) attributes {dimension_semantics = [#tpu.dimension_semantics<parallel>], iteration_bounds = array<i64: 2>, scalar_prefetch = 0 : i64, scratch_operands = 2 : i64, tpu.core_type = #tpu.core_type<tc>, window_params = [{transform_indices = @transform_0, window_bounds = array<i64: 4>}, {transform_indices = @transform_1, window_bounds = array<i64: 1, 4, 16, 16>}, {transform_indices = @transform_2, window_bounds = array<i64: 1, 16, 16>}, {transform_indices = @transform_3, window_bounds = array<i64: 1, 8, 128>}]} {
    %c0 = arith.constant 0 : index
    %c0_0 = arith.constant 0 : index
    %c0_1 = arith.constant 0 : index
    %c0_2 = arith.constant 0 : index
    %0 = vector.load %arg2[%c0, %c0_0, %c0_1, %c0_2] : memref<1x4x16x16xf32, #tpu.memory_space<vmem>>, vector<1x4x16x16xf32>
    %1 = vector.shape_cast %0 : vector<1x4x16x16xf32> to vector<4x16x16xf32>
    %c0_3 = arith.constant 0 : index
    %c0_4 = arith.constant 0 : index
    %c0_5 = arith.constant 0 : index
    %2 = vector.load %arg3[%c0_3, %c0_4, %c0_5] : memref<1x16x16xi32, #tpu.memory_space<vmem>>, vector<1x16x16xi32>
    %3 = vector.shape_cast %2 : vector<1x16x16xi32> to vector<16x16xi32>
    %c0_i32 = arith.constant 0 : i32
    %c3_i32 = arith.constant 3 : i32
    %4 = vector.broadcast %c0_i32 : i32 to vector<16x16xi32>
    %5 = arith.maxsi %4, %3 : vector<16x16xi32>
    %6 = vector.broadcast %c3_i32 : i32 to vector<16x16xi32>
    %7 = arith.minsi %6, %5 : vector<16x16xi32>
    %c-100_i32 = arith.constant -100 : i32
    %8 = vector.broadcast %c-100_i32 : i32 to vector<16x16xi32>
    %9 = arith.cmpi ne, %3, %8 : vector<16x16xi32>
    %10 = vector.extract_strided_slice %1 {offsets = [0, 0, 0], sizes = [1, 16, 16], strides = [1, 1, 1]} : vector<4x16x16xf32> to vector<1x16x16xf32>
    %11 = vector.shape_cast %10 : vector<1x16x16xf32> to vector<16x16xf32>
    %12 = vector.extract_strided_slice %1 {offsets = [1, 0, 0], sizes = [1, 16, 16], strides = [1, 1, 1]} : vector<4x16x16xf32> to vector<1x16x16xf32>
    %13 = vector.shape_cast %12 : vector<1x16x16xf32> to vector<16x16xf32>
    %14 = arith.maximumf %11, %13 : vector<16x16xf32>
    %15 = vector.extract_strided_slice %1 {offsets = [2, 0, 0], sizes = [1, 16, 16], strides = [1, 1, 1]} : vector<4x16x16xf32> to vector<1x16x16xf32>
    %16 = vector.shape_cast %15 : vector<1x16x16xf32> to vector<16x16xf32>
    %17 = arith.maximumf %14, %16 : vector<16x16xf32>
    %18 = vector.extract_strided_slice %1 {offsets = [3, 0, 0], sizes = [1, 16, 16], strides = [1, 1, 1]} : vector<4x16x16xf32> to vector<1x16x16xf32>
    %19 = vector.shape_cast %18 : vector<1x16x16xf32> to vector<16x16xf32>
    %20 = arith.maximumf %17, %19 : vector<16x16xf32>
    %21 = vector.extract_strided_slice %1 {offsets = [0, 0, 0], sizes = [1, 16, 16], strides = [1, 1, 1]} : vector<4x16x16xf32> to vector<1x16x16xf32>
    %22 = vector.shape_cast %21 : vector<1x16x16xf32> to vector<16x16xf32>
    %23 = arith.subf %22, %20 : vector<16x16xf32>
    %24 = math.exp %23 : vector<16x16xf32>
    %25 = vector.extract_strided_slice %1 {offsets = [1, 0, 0], sizes = [1, 16, 16], strides = [1, 1, 1]} : vector<4x16x16xf32> to vector<1x16x16xf32>
    %26 = vector.shape_cast %25 : vector<1x16x16xf32> to vector<16x16xf32>
    %27 = arith.subf %26, %20 : vector<16x16xf32>
    %28 = math.exp %27 : vector<16x16xf32>
    %29 = arith.addf %24, %28 : vector<16x16xf32>
    %30 = vector.extract_strided_slice %1 {offsets = [2, 0, 0], sizes = [1, 16, 16], strides = [1, 1, 1]} : vector<4x16x16xf32> to vector<1x16x16xf32>
    %31 = vector.shape_cast %30 : vector<1x16x16xf32> to vector<16x16xf32>
    %32 = arith.subf %31, %20 : vector<16x16xf32>
    %33 = math.exp %32 : vector<16x16xf32>
    %34 = arith.addf %29, %33 : vector<16x16xf32>
    %35 = vector.extract_strided_slice %1 {offsets = [3, 0, 0], sizes = [1, 16, 16], strides = [1, 1, 1]} : vector<4x16x16xf32> to vector<1x16x16xf32>
    %36 = vector.shape_cast %35 : vector<1x16x16xf32> to vector<16x16xf32>
    %37 = arith.subf %36, %20 : vector<16x16xf32>
    %38 = math.exp %37 : vector<16x16xf32>
    %39 = arith.addf %34, %38 : vector<16x16xf32>
    %40 = math.log %39 : vector<16x16xf32>
    %41 = arith.addf %40, %20 : vector<16x16xf32>
    %cst = arith.constant 0.000000e+00 : f32
    %42 = vector.broadcast %cst : f32 to vector<16x16xf32>
    %cst_6 = arith.constant 0.000000e+00 : f32
    %43 = vector.broadcast %cst_6 : f32 to vector<16x16xf32>
    %c0_i32_7 = arith.constant 0 : i32
    %44 = vector.broadcast %c0_i32_7 : i32 to vector<16x16xi32>
    %45 = arith.cmpi eq, %7, %44 : vector<16x16xi32>
    %46 = vector.extract_strided_slice %1 {offsets = [0, 0, 0], sizes = [1, 16, 16], strides = [1, 1, 1]} : vector<4x16x16xf32> to vector<1x16x16xf32>
    %47 = vector.shape_cast %46 : vector<1x16x16xf32> to vector<16x16xf32>
    %cst_8 = arith.constant 0.000000e+00 : f32
    %48 = vector.broadcast %cst_8 : f32 to vector<16x16xf32>
    %49 = arith.select %45, %47, %48 : vector<16x16xi1>, vector<16x16xf32>
    %50 = arith.addf %42, %49 : vector<16x16xf32>
    %c0_9 = arith.constant 0 : index
    %51 = memref.load %arg1[%c0_9] : memref<4xf32, #tpu.memory_space<smem>>
    %cst_10 = arith.constant 0.000000e+00 : f32
    %52 = vector.broadcast %51 : f32 to vector<16x16xf32>
    %53 = vector.broadcast %cst_10 : f32 to vector<16x16xf32>
    %54 = arith.select %45, %52, %53 : vector<16x16xi1>, vector<16x16xf32>
    %55 = arith.addf %43, %54 : vector<16x16xf32>
    %c1_i32 = arith.constant 1 : i32
    %56 = vector.broadcast %c1_i32 : i32 to vector<16x16xi32>
    %57 = arith.cmpi eq, %7, %56 : vector<16x16xi32>
    %58 = vector.extract_strided_slice %1 {offsets = [1, 0, 0], sizes = [1, 16, 16], strides = [1, 1, 1]} : vector<4x16x16xf32> to vector<1x16x16xf32>
    %59 = vector.shape_cast %58 : vector<1x16x16xf32> to vector<16x16xf32>
    %cst_11 = arith.constant 0.000000e+00 : f32
    %60 = vector.broadcast %cst_11 : f32 to vector<16x16xf32>
    %61 = arith.select %57, %59, %60 : vector<16x16xi1>, vector<16x16xf32>
    %62 = arith.addf %50, %61 : vector<16x16xf32>
    %c1 = arith.constant 1 : index
    %63 = memref.load %arg1[%c1] : memref<4xf32, #tpu.memory_space<smem>>
    %cst_12 = arith.constant 0.000000e+00 : f32
    %64 = vector.broadcast %63 : f32 to vector<16x16xf32>
    %65 = vector.broadcast %cst_12 : f32 to vector<16x16xf32>
    %66 = arith.select %57, %64, %65 : vector<16x16xi1>, vector<16x16xf32>
    %67 = arith.addf %55, %66 : vector<16x16xf32>
    %c2_i32 = arith.constant 2 : i32
    %68 = vector.broadcast %c2_i32 : i32 to vector<16x16xi32>
    %69 = arith.cmpi eq, %7, %68 : vector<16x16xi32>
    %70 = vector.extract_strided_slice %1 {offsets = [2, 0, 0], sizes = [1, 16, 16], strides = [1, 1, 1]} : vector<4x16x16xf32> to vector<1x16x16xf32>
    %71 = vector.shape_cast %70 : vector<1x16x16xf32> to vector<16x16xf32>
    %cst_13 = arith.constant 0.000000e+00 : f32
    %72 = vector.broadcast %cst_13 : f32 to vector<16x16xf32>
    %73 = arith.select %69, %71, %72 : vector<16x16xi1>, vector<16x16xf32>
    %74 = arith.addf %62, %73 : vector<16x16xf32>
    %c2 = arith.constant 2 : index
    %75 = memref.load %arg1[%c2] : memref<4xf32, #tpu.memory_space<smem>>
    %cst_14 = arith.constant 0.000000e+00 : f32
    %76 = vector.broadcast %75 : f32 to vector<16x16xf32>
    %77 = vector.broadcast %cst_14 : f32 to vector<16x16xf32>
    %78 = arith.select %69, %76, %77 : vector<16x16xi1>, vector<16x16xf32>
    %79 = arith.addf %67, %78 : vector<16x16xf32>
    %c3_i32_15 = arith.constant 3 : i32
    %80 = vector.broadcast %c3_i32_15 : i32 to vector<16x16xi32>
    %81 = arith.cmpi eq, %7, %80 : vector<16x16xi32>
    %82 = vector.extract_strided_slice %1 {offsets = [3, 0, 0], sizes = [1, 16, 16], strides = [1, 1, 1]} : vector<4x16x16xf32> to vector<1x16x16xf32>
    %83 = vector.shape_cast %82 : vector<1x16x16xf32> to vector<16x16xf32>
    %cst_16 = arith.constant 0.000000e+00 : f32
    %84 = vector.broadcast %cst_16 : f32 to vector<16x16xf32>
    %85 = arith.select %81, %83, %84 : vector<16x16xi1>, vector<16x16xf32>
    %86 = arith.addf %74, %85 : vector<16x16xf32>
    %c3 = arith.constant 3 : index
    %87 = memref.load %arg1[%c3] : memref<4xf32, #tpu.memory_space<smem>>
    %cst_17 = arith.constant 0.000000e+00 : f32
    %88 = vector.broadcast %87 : f32 to vector<16x16xf32>
    %89 = vector.broadcast %cst_17 : f32 to vector<16x16xf32>
    %90 = arith.select %81, %88, %89 : vector<16x16xi1>, vector<16x16xf32>
    %91 = arith.addf %79, %90 : vector<16x16xf32>
    %92 = arith.subf %41, %86 : vector<16x16xf32>
    %93 = arith.mulf %91, %92 : vector<16x16xf32>
    %cst_18 = arith.constant 0.000000e+00 : f32
    %94 = vector.broadcast %cst_18 : f32 to vector<16x16xf32>
    %95 = arith.select %9, %93, %94 : vector<16x16xi1>, vector<16x16xf32>
    %c0_i32_19 = arith.constant 0 : i32
    %96 = vector.broadcast %c0_i32_19 : i32 to vector<16x16xi32>
    %97 = arith.cmpi eq, %7, %96 : vector<16x16xi32>
    %cst_20 = arith.constant 0.000000e+00 : f32
    %cst_21 = arith.constant 1.000000e+00 : f32
    %98 = vector.broadcast %cst_20 : f32 to vector<16x16xf32>
    %99 = vector.broadcast %cst_21 : f32 to vector<16x16xf32>
    %100 = arith.select %97, %98, %99 : vector<16x16xi1>, vector<16x16xf32>
    %101 = arith.truncf %100 : vector<16x16xf32> to vector<16x16xbf16>
    %c0_22 = arith.constant 0 : index
    %c0_23 = arith.constant 0 : index
    %102 = vector.load %arg5[%c0_22, %c0_23] : memref<64x16xbf16, #tpu.memory_space<vmem>>, vector<16x16xbf16>
    tpu.vector_store %arg5[%c0_22, %c0_23], %101 {strides = array<i32>} : memref<64x16xbf16, #tpu.memory_space<vmem>>, vector<16x16xbf16>,
    %cst_24 = arith.constant 0.000000e+00 : f32
    %103 = vector.broadcast %cst_24 : f32 to vector<16x16xf32>
    %104 = arith.select %97, %95, %103 : vector<16x16xi1>, vector<16x16xf32>
    %105 = arith.truncf %104 : vector<16x16xf32> to vector<16x16xbf16>
    %106 = arith.extf %105 : vector<16x16xbf16> to vector<16x16xf32>
    %107 = arith.subf %104, %106 : vector<16x16xf32>
    %108 = arith.truncf %107 : vector<16x16xf32> to vector<16x16xbf16>
    %c0_25 = arith.constant 0 : index
    %c0_26 = arith.constant 0 : index
    %109 = vector.load %arg6[%c0_25, %c0_26] : memref<16x128xbf16, #tpu.memory_space<vmem>>, vector<16x16xbf16>
    tpu.vector_store %arg6[%c0_25, %c0_26], %105 {strides = array<i32>} : memref<16x128xbf16, #tpu.memory_space<vmem>>, vector<16x16xbf16>,
    %c0_27 = arith.constant 0 : index
    %c64 = arith.constant 64 : index
    %110 = vector.load %arg6[%c0_27, %c64] : memref<16x128xbf16, #tpu.memory_space<vmem>>, vector<16x16xbf16>
    tpu.vector_store %arg6[%c0_27, %c64], %108 {strides = array<i32>} : memref<16x128xbf16, #tpu.memory_space<vmem>>, vector<16x16xbf16>,
    %c1_i32_28 = arith.constant 1 : i32
    %111 = vector.broadcast %c1_i32_28 : i32 to vector<16x16xi32>
    %112 = arith.cmpi eq, %7, %111 : vector<16x16xi32>
    %cst_29 = arith.constant 0.000000e+00 : f32
    %cst_30 = arith.constant 1.000000e+00 : f32
    %113 = vector.broadcast %cst_29 : f32 to vector<16x16xf32>
    %114 = vector.broadcast %cst_30 : f32 to vector<16x16xf32>
    %115 = arith.select %112, %113, %114 : vector<16x16xi1>, vector<16x16xf32>
    %116 = arith.truncf %115 : vector<16x16xf32> to vector<16x16xbf16>
    %c16 = arith.constant 16 : index
    %c0_31 = arith.constant 0 : index
    %117 = vector.load %arg5[%c16, %c0_31] : memref<64x16xbf16, #tpu.memory_space<vmem>>, vector<16x16xbf16>
    tpu.vector_store %arg5[%c16, %c0_31], %116 {strides = array<i32>} : memref<64x16xbf16, #tpu.memory_space<vmem>>, vector<16x16xbf16>,
    %cst_32 = arith.constant 0.000000e+00 : f32
    %118 = vector.broadcast %cst_32 : f32 to vector<16x16xf32>
    %119 = arith.select %112, %95, %118 : vector<16x16xi1>, vector<16x16xf32>
    %120 = arith.truncf %119 : vector<16x16xf32> to vector<16x16xbf16>
    %121 = arith.extf %120 : vector<16x16xbf16> to vector<16x16xf32>
    %122 = arith.subf %119, %121 : vector<16x16xf32>
    %123 = arith.truncf %122 : vector<16x16xf32> to vector<16x16xbf16>
    %c0_33 = arith.constant 0 : index
    %c16_34 = arith.constant 16 : index
    %124 = vector.load %arg6[%c0_33, %c16_34] : memref<16x128xbf16, #tpu.memory_space<vmem>>, vector<16x16xbf16>
    tpu.vector_store %arg6[%c0_33, %c16_34], %120 {strides = array<i32>} : memref<16x128xbf16, #tpu.memory_space<vmem>>, vector<16x16xbf16>,
    %c0_35 = arith.constant 0 : index
    %c80 = arith.constant 80 : index
    %125 = vector.load %arg6[%c0_35, %c80] : memref<16x128xbf16, #tpu.memory_space<vmem>>, vector<16x16xbf16>
    tpu.vector_store %arg6[%c0_35, %c80], %123 {strides = array<i32>} : memref<16x128xbf16, #tpu.memory_space<vmem>>, vector<16x16xbf16>,
    %c2_i32_36 = arith.constant 2 : i32
    %126 = vector.broadcast %c2_i32_36 : i32 to vector<16x16xi32>
    %127 = arith.cmpi eq, %7, %126 : vector<16x16xi32>
    %cst_37 = arith.constant 0.000000e+00 : f32
    %cst_38 = arith.constant 1.000000e+00 : f32
    %128 = vector.broadcast %cst_37 : f32 to vector<16x16xf32>
    %129 = vector.broadcast %cst_38 : f32 to vector<16x16xf32>
    %130 = arith.select %127, %128, %129 : vector<16x16xi1>, vector<16x16xf32>
    %131 = arith.truncf %130 : vector<16x16xf32> to vector<16x16xbf16>
    %c32 = arith.constant 32 : index
    %c0_39 = arith.constant 0 : index
    %132 = vector.load %arg5[%c32, %c0_39] : memref<64x16xbf16, #tpu.memory_space<vmem>>, vector<16x16xbf16>
    tpu.vector_store %arg5[%c32, %c0_39], %131 {strides = array<i32>} : memref<64x16xbf16, #tpu.memory_space<vmem>>, vector<16x16xbf16>,
    %cst_40 = arith.constant 0.000000e+00 : f32
    %133 = vector.broadcast %cst_40 : f32 to vector<16x16xf32>
    %134 = arith.select %127, %95, %133 : vector<16x16xi1>, vector<16x16xf32>
    %135 = arith.truncf %134 : vector<16x16xf32> to vector<16x16xbf16>
    %136 = arith.extf %135 : vector<16x16xbf16> to vector<16x16xf32>
    %137 = arith.subf %134, %136 : vector<16x16xf32>
    %138 = arith.truncf %137 : vector<16x16xf32> to vector<16x16xbf16>
    %c0_41 = arith.constant 0 : index
    %c32_42 = arith.constant 32 : index
    %139 = vector.load %arg6[%c0_41, %c32_42] : memref<16x128xbf16, #tpu.memory_space<vmem>>, vector<16x16xbf16>
    tpu.vector_store %arg6[%c0_41, %c32_42], %135 {strides = array<i32>} : memref<16x128xbf16, #tpu.memory_space<vmem>>, vector<16x16xbf16>,
    %c0_43 = arith.constant 0 : index
    %c96 = arith.constant 96 : index
    %140 = vector.load %arg6[%c0_43, %c96] : memref<16x128xbf16, #tpu.memory_space<vmem>>, vector<16x16xbf16>
    tpu.vector_store %arg6[%c0_43, %c96], %138 {strides = array<i32>} : memref<16x128xbf16, #tpu.memory_space<vmem>>, vector<16x16xbf16>,
    %c3_i32_44 = arith.constant 3 : i32
    %141 = vector.broadcast %c3_i32_44 : i32 to vector<16x16xi32>
    %142 = arith.cmpi eq, %7, %141 : vector<16x16xi32>
    %cst_45 = arith.constant 0.000000e+00 : f32
    %cst_46 = arith.constant 1.000000e+00 : f32
    %143 = vector.broadcast %cst_45 : f32 to vector<16x16xf32>
    %144 = vector.broadcast %cst_46 : f32 to vector<16x16xf32>
    %145 = arith.select %142, %143, %144 : vector<16x16xi1>, vector<16x16xf32>
    %146 = arith.truncf %145 : vector<16x16xf32> to vector<16x16xbf16>
    %c48 = arith.constant 48 : index
    %c0_47 = arith.constant 0 : index
    %147 = vector.load %arg5[%c48, %c0_47] : memref<64x16xbf16, #tpu.memory_space<vmem>>, vector<16x16xbf16>
    tpu.vector_store %arg5[%c48, %c0_47], %146 {strides = array<i32>} : memref<64x16xbf16, #tpu.memory_space<vmem>>, vector<16x16xbf16>,
    %cst_48 = arith.constant 0.000000e+00 : f32
    %148 = vector.broadcast %cst_48 : f32 to vector<16x16xf32>
    %149 = arith.select %142, %95, %148 : vector<16x16xi1>, vector<16x16xf32>
    %150 = arith.truncf %149 : vector<16x16xf32> to vector<16x16xbf16>
    %151 = arith.extf %150 : vector<16x16xbf16> to vector<16x16xf32>
    %152 = arith.subf %149, %151 : vector<16x16xf32>
    %153 = arith.truncf %152 : vector<16x16xf32> to vector<16x16xbf16>
    %c0_49 = arith.constant 0 : index
    %c48_50 = arith.constant 48 : index
    %154 = vector.load %arg6[%c0_49, %c48_50] : memref<16x128xbf16, #tpu.memory_space<vmem>>, vector<16x16xbf16>
    tpu.vector_store %arg6[%c0_49, %c48_50], %150 {strides = array<i32>} : memref<16x128xbf16, #tpu.memory_space<vmem>>, vector<16x16xbf16>,
    %c0_51 = arith.constant 0 : index
    %c112 = arith.constant 112 : index
    %155 = vector.load %arg6[%c0_51, %c112] : memref<16x128xbf16, #tpu.memory_space<vmem>>, vector<16x16xbf16>
    tpu.vector_store %arg6[%c0_51, %c112], %153 {strides = array<i32>} : memref<16x128xbf16, #tpu.memory_space<vmem>>, vector<16x16xbf16>,
    %156 = tpu.iota {dimensions = array<i32: 0>} : vector<16x16xi32>
    %157 = tpu.iota {dimensions = array<i32: 1>} : vector<16x16xi32>
    %158 = tpu.iota {dimensions = array<i32: 0>} : vector<16x16xi32>
    %159 = tpu.iota {dimensions = array<i32: 1>} : vector<16x16xi32>
    %160 = arith.subi %156, %157 : vector<16x16xi32>
    %161 = math.absi %160 : vector<16x16xi32>
    %c1_i32_52 = arith.constant 1 : i32
    %162 = vector.broadcast %c1_i32_52 : i32 to vector<16x16xi32>
    %163 = arith.cmpi sle, %161, %162 : vector<16x16xi32>
    %164 = arith.extui %163 : vector<16x16xi1> to vector<16x16xi32>
    %165 = arith.sitofp %164 : vector<16x16xi32> to vector<16x16xf32>
    %166 = arith.truncf %165 : vector<16x16xf32> to vector<16x16xbf16>
    %167 = arith.subi %156, %157 : vector<16x16xi32>
    %168 = math.absi %167 : vector<16x16xi32>
    %c2_i32_53 = arith.constant 2 : i32
    %169 = vector.broadcast %c2_i32_53 : i32 to vector<16x16xi32>
    %170 = arith.cmpi sle, %168, %169 : vector<16x16xi32>
    %171 = arith.extui %170 : vector<16x16xi1> to vector<16x16xi32>
    %172 = arith.sitofp %171 : vector<16x16xi32> to vector<16x16xf32>
    %173 = arith.truncf %172 : vector<16x16xf32> to vector<16x16xbf16>
    %174 = arith.subi %156, %157 : vector<16x16xi32>
    %175 = math.absi %174 : vector<16x16xi32>
    %c4_i32 = arith.constant 4 : i32
    %176 = vector.broadcast %c4_i32 : i32 to vector<16x16xi32>
    %177 = arith.cmpi sle, %175, %176 : vector<16x16xi32>
    %178 = arith.extui %177 : vector<16x16xi1> to vector<16x16xi32>
    %179 = arith.sitofp %178 : vector<16x16xi32> to vector<16x16xf32>
    %180 = arith.truncf %179 : vector<16x16xf32> to vector<16x16xbf16>
    %181 = arith.subi %156, %157 : vector<16x16xi32>
    %182 = math.absi %181 : vector<16x16xi32>
    %c8_i32 = arith.constant 8 : i32
    %183 = vector.broadcast %c8_i32 : i32 to vector<16x16xi32>
    %184 = arith.cmpi sle, %182, %183 : vector<16x16xi32>
    %185 = arith.extui %184 : vector<16x16xi1> to vector<16x16xi32>
    %186 = arith.sitofp %185 : vector<16x16xi32> to vector<16x16xf32>
    %187 = arith.truncf %186 : vector<16x16xf32> to vector<16x16xbf16>
    %188 = arith.subi %156, %157 : vector<16x16xi32>
    %189 = math.absi %188 : vector<16x16xi32>
    %c16_i32 = arith.constant 16 : i32
    %190 = vector.broadcast %c16_i32 : i32 to vector<16x16xi32>
    %191 = arith.cmpi sle, %189, %190 : vector<16x16xi32>
    %192 = arith.extui %191 : vector<16x16xi1> to vector<16x16xi32>
    %193 = arith.sitofp %192 : vector<16x16xi32> to vector<16x16xf32>
    %194 = arith.truncf %193 : vector<16x16xf32> to vector<16x16xbf16>
    %195 = tpu.concatenate %166, %173, %180, %187, %194 in 0 : vector<16x16xbf16>, vector<16x16xbf16>, vector<16x16xbf16>, vector<16x16xbf16>, vector<16x16xbf16> -> vector<80x16xbf16>
    %196 = arith.subi %158, %159 : vector<16x16xi32>
    %197 = math.absi %196 : vector<16x16xi32>
    %c1_i32_54 = arith.constant 1 : i32
    %198 = vector.broadcast %c1_i32_54 : i32 to vector<16x16xi32>
    %199 = arith.cmpi sle, %197, %198 : vector<16x16xi32>
    %200 = arith.extui %199 : vector<16x16xi1> to vector<16x16xi32>
    %201 = arith.sitofp %200 : vector<16x16xi32> to vector<16x16xf32>
    %202 = arith.truncf %201 : vector<16x16xf32> to vector<16x16xbf16>
    %203 = arith.subi %158, %159 : vector<16x16xi32>
    %204 = math.absi %203 : vector<16x16xi32>
    %c2_i32_55 = arith.constant 2 : i32
    %205 = vector.broadcast %c2_i32_55 : i32 to vector<16x16xi32>
    %206 = arith.cmpi sle, %204, %205 : vector<16x16xi32>
    %207 = arith.extui %206 : vector<16x16xi1> to vector<16x16xi32>
    %208 = arith.sitofp %207 : vector<16x16xi32> to vector<16x16xf32>
    %209 = arith.truncf %208 : vector<16x16xf32> to vector<16x16xbf16>
    %210 = arith.subi %158, %159 : vector<16x16xi32>
    %211 = math.absi %210 : vector<16x16xi32>
    %c4_i32_56 = arith.constant 4 : i32
    %212 = vector.broadcast %c4_i32_56 : i32 to vector<16x16xi32>
    %213 = arith.cmpi sle, %211, %212 : vector<16x16xi32>
    %214 = arith.extui %213 : vector<16x16xi1> to vector<16x16xi32>
    %215 = arith.sitofp %214 : vector<16x16xi32> to vector<16x16xf32>
    %216 = arith.truncf %215 : vector<16x16xf32> to vector<16x16xbf16>
    %217 = arith.subi %158, %159 : vector<16x16xi32>
    %218 = math.absi %217 : vector<16x16xi32>
    %c8_i32_57 = arith.constant 8 : i32
    %219 = vector.broadcast %c8_i32_57 : i32 to vector<16x16xi32>
    %220 = arith.cmpi sle, %218, %219 : vector<16x16xi32>
    %221 = arith.extui %220 : vector<16x16xi1> to vector<16x16xi32>
    %222 = arith.sitofp %221 : vector<16x16xi32> to vector<16x16xf32>
    %223 = arith.truncf %222 : vector<16x16xf32> to vector<16x16xbf16>
    %224 = arith.subi %158, %159 : vector<16x16xi32>
    %225 = math.absi %224 : vector<16x16xi32>
    %c16_i32_58 = arith.constant 16 : i32
    %226 = vector.broadcast %c16_i32_58 : i32 to vector<16x16xi32>
    %227 = arith.cmpi sle, %225, %226 : vector<16x16xi32>
    %228 = arith.extui %227 : vector<16x16xi1> to vector<16x16xi32>
    %229 = arith.sitofp %228 : vector<16x16xi32> to vector<16x16xf32>
    %230 = arith.truncf %229 : vector<16x16xf32> to vector<16x16xbf16>
    %231 = tpu.concatenate %202, %209, %216, %223, %230 in 1 : vector<16x16xbf16>, vector<16x16xbf16>, vector<16x16xbf16>, vector<16x16xbf16>, vector<16x16xbf16> -> vector<16x80xbf16>
    %c0_59 = arith.constant 0 : index
    %c0_60 = arith.constant 0 : index
    %232 = vector.load %arg5[%c0_59, %c0_60] : memref<64x16xbf16, #tpu.memory_space<vmem>>, vector<64x16xbf16>
    %cst_61 = arith.constant dense<0.000000e+00> : vector<64x80xf32>
    %233 = tpu.matmul %232, %231, %cst_61 {dimension_numbers = #tpu.dot_dimension_numbers<[1], [0], [0], [1], [0, 0, 1, 1], [], []>} : vector<64x16xbf16>, vector<16x80xbf16>, vector<64x80xf32> -> vector<64x80xf32>
    %c0_62 = arith.constant 0 : index
    %c0_63 = arith.constant 0 : index
    %234 = vector.load %arg6[%c0_62, %c0_63] : memref<16x128xbf16, #tpu.memory_space<vmem>>, vector<16x128xbf16>
    %cst_64 = arith.constant dense<0.000000e+00> : vector<80x128xf32>
    %235 = tpu.matmul %195, %234, %cst_64 {dimension_numbers = #tpu.dot_dimension_numbers<[1], [0], [0], [1], [0, 0, 1, 1], [], []>} : vector<80x16xbf16>, vector<16x128xbf16>, vector<80x128xf32> -> vector<80x128xf32>
    %236 = vector.extract_strided_slice %235 {offsets = [0, 0], sizes = [80, 64], strides = [1, 1]} : vector<80x128xf32> to vector<80x64xf32>
    %237 = vector.extract_strided_slice %235 {offsets = [0, 64], sizes = [80, 64], strides = [1, 1]} : vector<80x128xf32> to vector<80x64xf32>
    %238 = arith.addf %236, %237 : vector<80x64xf32>
    %cst_65 = arith.constant 0.000000e+00 : f32
    %239 = vector.broadcast %cst_65 : f32 to vector<16x16xf32>
    %cst_66 = arith.constant 0.000000e+00 : f32
    %240 = vector.broadcast %cst_66 : f32 to vector<16x16xf32>
    %241 = vector.extract_strided_slice %238 {offsets = [0, 0], sizes = [16, 16], strides = [1, 1]} : vector<80x64xf32> to vector<16x16xf32>
    %242 = vector.extract_strided_slice %233 {offsets = [0, 0], sizes = [16, 16], strides = [1, 1]} : vector<64x80xf32> to vector<16x16xf32>
    %243 = arith.mulf %241, %242 : vector<16x16xf32>
    %244 = arith.addf %240, %243 : vector<16x16xf32>
    %245 = vector.extract_strided_slice %238 {offsets = [0, 16], sizes = [16, 16], strides = [1, 1]} : vector<80x64xf32> to vector<16x16xf32>
    %246 = vector.extract_strided_slice %233 {offsets = [16, 0], sizes = [16, 16], strides = [1, 1]} : vector<64x80xf32> to vector<16x16xf32>
    %247 = arith.mulf %245, %246 : vector<16x16xf32>
    %248 = arith.addf %244, %247 : vector<16x16xf32>
    %249 = vector.extract_strided_slice %238 {offsets = [0, 32], sizes = [16, 16], strides = [1, 1]} : vector<80x64xf32> to vector<16x16xf32>
    %250 = vector.extract_strided_slice %233 {offsets = [32, 0], sizes = [16, 16], strides = [1, 1]} : vector<64x80xf32> to vector<16x16xf32>
    %251 = arith.mulf %249, %250 : vector<16x16xf32>
    %252 = arith.addf %248, %251 : vector<16x16xf32>
    %253 = vector.extract_strided_slice %238 {offsets = [0, 48], sizes = [16, 16], strides = [1, 1]} : vector<80x64xf32> to vector<16x16xf32>
    %254 = vector.extract_strided_slice %233 {offsets = [48, 0], sizes = [16, 16], strides = [1, 1]} : vector<64x80xf32> to vector<16x16xf32>
    %255 = arith.mulf %253, %254 : vector<16x16xf32>
    %256 = arith.addf %252, %255 : vector<16x16xf32>
    %cst_67 = arith.constant 1.250000e-01 : f32
    %257 = vector.broadcast %cst_67 : f32 to vector<16x16xf32>
    %258 = arith.mulf %257, %256 : vector<16x16xf32>
    %259 = arith.addf %239, %258 : vector<16x16xf32>
    %cst_68 = arith.constant 0.000000e+00 : f32
    %260 = vector.broadcast %cst_68 : f32 to vector<16x16xf32>
    %261 = vector.extract_strided_slice %238 {offsets = [16, 0], sizes = [16, 16], strides = [1, 1]} : vector<80x64xf32> to vector<16x16xf32>
    %262 = vector.extract_strided_slice %233 {offsets = [0, 16], sizes = [16, 16], strides = [1, 1]} : vector<64x80xf32> to vector<16x16xf32>
    %263 = arith.mulf %261, %262 : vector<16x16xf32>
    %264 = arith.addf %260, %263 : vector<16x16xf32>
    %265 = vector.extract_strided_slice %238 {offsets = [16, 16], sizes = [16, 16], strides = [1, 1]} : vector<80x64xf32> to vector<16x16xf32>
    %266 = vector.extract_strided_slice %233 {offsets = [16, 16], sizes = [16, 16], strides = [1, 1]} : vector<64x80xf32> to vector<16x16xf32>
    %267 = arith.mulf %265, %266 : vector<16x16xf32>
    %268 = arith.addf %264, %267 : vector<16x16xf32>
    %269 = vector.extract_strided_slice %238 {offsets = [16, 32], sizes = [16, 16], strides = [1, 1]} : vector<80x64xf32> to vector<16x16xf32>
    %270 = vector.extract_strided_slice %233 {offsets = [32, 16], sizes = [16, 16], strides = [1, 1]} : vector<64x80xf32> to vector<16x16xf32>
    %271 = arith.mulf %269, %270 : vector<16x16xf32>
    %272 = arith.addf %268, %271 : vector<16x16xf32>
    %273 = vector.extract_strided_slice %238 {offsets = [16, 48], sizes = [16, 16], strides = [1, 1]} : vector<80x64xf32> to vector<16x16xf32>
    %274 = vector.extract_strided_slice %233 {offsets = [48, 16], sizes = [16, 16], strides = [1, 1]} : vector<64x80xf32> to vector<16x16xf32>
    %275 = arith.mulf %273, %274 : vector<16x16xf32>
    %276 = arith.addf %272, %275 : vector<16x16xf32>
    %cst_69 = arith.constant 0.0416666679 : f32
    %277 = vector.broadcast %cst_69 : f32 to vector<16x16xf32>
    %278 = arith.mulf %277, %276 : vector<16x16xf32>
    %279 = arith.addf %259, %278 : vector<16x16xf32>
    %cst_70 = arith.constant 0.000000e+00 : f32
    %280 = vector.broadcast %cst_70 : f32 to vector<16x16xf32>
    %281 = vector.extract_strided_slice %238 {offsets = [32, 0], sizes = [16, 16], strides = [1, 1]} : vector<80x64xf32> to vector<16x16xf32>
    %282 = vector.extract_strided_slice %233 {offsets = [0, 32], sizes = [16, 16], strides = [1, 1]} : vector<64x80xf32> to vector<16x16xf32>
    %283 = arith.mulf %281, %282 : vector<16x16xf32>
    %284 = arith.addf %280, %283 : vector<16x16xf32>
    %285 = vector.extract_strided_slice %238 {offsets = [32, 16], sizes = [16, 16], strides = [1, 1]} : vector<80x64xf32> to vector<16x16xf32>
    %286 = vector.extract_strided_slice %233 {offsets = [16, 32], sizes = [16, 16], strides = [1, 1]} : vector<64x80xf32> to vector<16x16xf32>
    %287 = arith.mulf %285, %286 : vector<16x16xf32>
    %288 = arith.addf %284, %287 : vector<16x16xf32>
    %289 = vector.extract_strided_slice %238 {offsets = [32, 32], sizes = [16, 16], strides = [1, 1]} : vector<80x64xf32> to vector<16x16xf32>
    %290 = vector.extract_strided_slice %233 {offsets = [32, 32], sizes = [16, 16], strides = [1, 1]} : vector<64x80xf32> to vector<16x16xf32>
    %291 = arith.mulf %289, %290 : vector<16x16xf32>
    %292 = arith.addf %288, %291 : vector<16x16xf32>
    %293 = vector.extract_strided_slice %238 {offsets = [32, 48], sizes = [16, 16], strides = [1, 1]} : vector<80x64xf32> to vector<16x16xf32>
    %294 = vector.extract_strided_slice %233 {offsets = [48, 32], sizes = [16, 16], strides = [1, 1]} : vector<64x80xf32> to vector<16x16xf32>
    %295 = arith.mulf %293, %294 : vector<16x16xf32>
    %296 = arith.addf %292, %295 : vector<16x16xf32>
    %cst_71 = arith.constant 1.250000e-02 : f32
    %297 = vector.broadcast %cst_71 : f32 to vector<16x16xf32>
    %298 = arith.mulf %297, %296 : vector<16x16xf32>
    %299 = arith.addf %279, %298 : vector<16x16xf32>
    %cst_72 = arith.constant 0.000000e+00 : f32
    %300 = vector.broadcast %cst_72 : f32 to vector<16x16xf32>
    %301 = vector.extract_strided_slice %238 {offsets = [48, 0], sizes = [16, 16], strides = [1, 1]} : vector<80x64xf32> to vector<16x16xf32>
    %302 = vector.extract_strided_slice %233 {offsets = [0, 48], sizes = [16, 16], strides = [1, 1]} : vector<64x80xf32> to vector<16x16xf32>
    %303 = arith.mulf %301, %302 : vector<16x16xf32>
    %304 = arith.addf %300, %303 : vector<16x16xf32>
    %305 = vector.extract_strided_slice %238 {offsets = [48, 16], sizes = [16, 16], strides = [1, 1]} : vector<80x64xf32> to vector<16x16xf32>
    %306 = vector.extract_strided_slice %233 {offsets = [16, 48], sizes = [16, 16], strides = [1, 1]} : vector<64x80xf32> to vector<16x16xf32>
    %307 = arith.mulf %305, %306 : vector<16x16xf32>
    %308 = arith.addf %304, %307 : vector<16x16xf32>
    %309 = vector.extract_strided_slice %238 {offsets = [48, 32], sizes = [16, 16], strides = [1, 1]} : vector<80x64xf32> to vector<16x16xf32>
    %310 = vector.extract_strided_slice %233 {offsets = [32, 48], sizes = [16, 16], strides = [1, 1]} : vector<64x80xf32> to vector<16x16xf32>
    %311 = arith.mulf %309, %310 : vector<16x16xf32>
    %312 = arith.addf %308, %311 : vector<16x16xf32>
    %313 = vector.extract_strided_slice %238 {offsets = [48, 48], sizes = [16, 16], strides = [1, 1]} : vector<80x64xf32> to vector<16x16xf32>
    %314 = vector.extract_strided_slice %233 {offsets = [48, 48], sizes = [16, 16], strides = [1, 1]} : vector<64x80xf32> to vector<16x16xf32>
    %315 = arith.mulf %313, %314 : vector<16x16xf32>
    %316 = arith.addf %312, %315 : vector<16x16xf32>
    %cst_73 = arith.constant 0.00347222225 : f32
    %317 = vector.broadcast %cst_73 : f32 to vector<16x16xf32>
    %318 = arith.mulf %317, %316 : vector<16x16xf32>
    %319 = arith.addf %299, %318 : vector<16x16xf32>
    %cst_74 = arith.constant 0.000000e+00 : f32
    %320 = vector.broadcast %cst_74 : f32 to vector<16x16xf32>
    %321 = vector.extract_strided_slice %238 {offsets = [64, 0], sizes = [16, 16], strides = [1, 1]} : vector<80x64xf32> to vector<16x16xf32>
    %322 = vector.extract_strided_slice %233 {offsets = [0, 64], sizes = [16, 16], strides = [1, 1]} : vector<64x80xf32> to vector<16x16xf32>
    %323 = arith.mulf %321, %322 : vector<16x16xf32>
    %324 = arith.addf %320, %323 : vector<16x16xf32>
    %325 = vector.extract_strided_slice %238 {offsets = [64, 16], sizes = [16, 16], strides = [1, 1]} : vector<80x64xf32> to vector<16x16xf32>
    %326 = vector.extract_strided_slice %233 {offsets = [16, 64], sizes = [16, 16], strides = [1, 1]} : vector<64x80xf32> to vector<16x16xf32>
    %327 = arith.mulf %325, %326 : vector<16x16xf32>
    %328 = arith.addf %324, %327 : vector<16x16xf32>
    %329 = vector.extract_strided_slice %238 {offsets = [64, 32], sizes = [16, 16], strides = [1, 1]} : vector<80x64xf32> to vector<16x16xf32>
    %330 = vector.extract_strided_slice %233 {offsets = [32, 64], sizes = [16, 16], strides = [1, 1]} : vector<64x80xf32> to vector<16x16xf32>
    %331 = arith.mulf %329, %330 : vector<16x16xf32>
    %332 = arith.addf %328, %331 : vector<16x16xf32>
    %333 = vector.extract_strided_slice %238 {offsets = [64, 48], sizes = [16, 16], strides = [1, 1]} : vector<80x64xf32> to vector<16x16xf32>
    %334 = vector.extract_strided_slice %233 {offsets = [48, 64], sizes = [16, 16], strides = [1, 1]} : vector<64x80xf32> to vector<16x16xf32>
    %335 = arith.mulf %333, %334 : vector<16x16xf32>
    %336 = arith.addf %332, %335 : vector<16x16xf32>
    %cst_75 = arith.constant 9.1911765E-4 : f32
    %337 = vector.broadcast %cst_75 : f32 to vector<16x16xf32>
    %338 = arith.mulf %337, %336 : vector<16x16xf32>
    %339 = arith.addf %319, %338 : vector<16x16xf32>
    %340 = arith.addf %95, %339 : vector<16x16xf32>
    %341 = vector.shape_cast %340 : vector<16x16xf32> to vector<1x16x16xf32>
    %cst_76 = arith.constant dense<0.000000e+00> : vector<1xf32>
    %342 = vector.multi_reduction <add>, %341, %cst_76 [1, 2] : vector<1x16x16xf32> to vector<1xf32>
    %343 = vector.shape_cast %342 : vector<1xf32> to vector<1x1x1xf32>
    %344 = vector.extract %343[0, 0, 0] : f32 from vector<1x1x1xf32>
    %345 = vector.broadcast %344 : f32 to vector<8x128xf32>
    %c0_77 = arith.constant 0 : index
    %c0_78 = arith.constant 0 : index
    %c0_79 = arith.constant 0 : index
    %346 = vector.load %arg4[%c0_77, %c0_78, %c0_79] : memref<1x8x128xf32, #tpu.memory_space<vmem>>, vector<1x8x128xf32>
    %347 = vector.shape_cast %346 : vector<1x8x128xf32> to vector<8x128xf32>
    %348 = vector.shape_cast %345 : vector<8x128xf32> to vector<1x8x128xf32>
    tpu.vector_store %arg4[%c0_77, %c0_78, %c0_79], %348 {strides = array<i32>} : memref<1x8x128xf32, #tpu.memory_space<vmem>>, vector<1x8x128xf32>,
    return
  }
  func.func @transform_0(%arg0: i32) -> i32 {
    %c0_i32 = arith.constant 0 : i32
    %c0_i32_0 = arith.constant 0 : i32
    return %c0_i32 : i32
  }
  func.func @transform_1(%arg0: i32) -> (i32, i32, i32, i32) {
    %c0_i32 = arith.constant 0 : i32
    %c0_i32_0 = arith.constant 0 : i32
    %c0_i32_1 = arith.constant 0 : i32
    %c0_i32_2 = arith.constant 0 : i32
    return %arg0, %c0_i32, %c0_i32_0, %c0_i32_1 : i32, i32, i32, i32
  }
  func.func @transform_2(%arg0: i32) -> (i32, i32, i32) {
    %c0_i32 = arith.constant 0 : i32
    %c0_i32_0 = arith.constant 0 : i32
    %c0_i32_1 = arith.constant 0 : i32
    return %arg0, %c0_i32, %c0_i32_0 : i32, i32, i32
  }
  func.func @transform_3(%arg0: i32) -> (i32, i32, i32) {
    %c0_i32 = arith.constant 0 : i32
    %c0_i32_0 = arith.constant 0 : i32
    %c0_i32_1 = arith.constant 0 : i32
    return %arg0, %c0_i32, %c0_i32_0 : i32, i32, i32
  }
}

</mosaic_0001>

<bundles_post_ra>
// kernel: tpu_custom_call.1
= control target key start
LH: loop header
LB: loop body
LE: loop exit
PB: predicated region body
PF: predicated region fallthrough
CT: control target
= control target key end

     0   :  { %8 = vsyncpa [#allocation7], 0  ;;  %s2310_s0 = inlined_call_operand.hbm [shape: f32[4], index: 0, kind: input, shape index: {}]   ;;  %s2311_s1 = inlined_call_operand.hbm [shape: f32[2,4,16,16], index: 1, kind: input, shape index: {}]   ;;  %s2312_s2 = inlined_call_operand.hbm [shape: s32[2,16,16], index: 2, kind: input, shape index: {}]   ;;  %s2313_s3 = inlined_call_operand.hbm [shape: f32[2,8,128], index: 3, kind: output, shape index: {}]  }
   0x1   :  { %9 = vsyncpa [#allocation5], 0 }
   0x2   :  { %11 = vsyncpa [#allocation5 + $0x1], 0 }
   0x3   :  { %12 = vsyncpa [#allocation10], 0 }
   0x4   :  { %14 = vsyncpa [#allocation10 + $0x1], 0 }
   0x5   :  { %15 = vsyncpa [#allocation6], 0 }
   0x6   :  { %17 = vsyncpa [#allocation6 + $0x1], 0  ;;  %s1572_s12 = smov 0   ;;  %s1574_s13 = smov 0  }
   0x7   :  { %s1576_s14 = smov 0   ;;  %s1578_s15 = smov 0  }
   0x8 LB: > { %s1593_s16 = sadd.s32 4294967295, %s1534_s15   ;;  %s1201_s17 = sadd.s32 4294967294, %s1534_s15   ;;  %s1534_s15 = sphi %s1578_s15, %s2333_s15   ;;  %s1530_s14 = sphi %s1576_s14, %s2332_s14   ;;  %s1526_s13 = sphi %s1574_s13, %s2331_s13   ;;  %s1522_s12 = sphi %s1572_s12, %s2330_s12  }
   0x9   : > { %s1597_s18 = sadd.s32 1, %s1534_s15   ;;  %s51_s19 = sadd.s32 1, %s1530_s14 }
   0xa   : > { %s48_s20 = ssub.s32 %s1534_s15, %s1597_s18  ;;  %p58_p0 = scmp.ne.s32.totalorder %s1530_s14, %s1526_s13 }
   0xb   : > { %p49_p1 = scmp.eq.s32.totalorder %s48_s20, 0  ;;  %p59_p2 = scmp.eq.s32.totalorder %s1534_s15, 0 }
   0xc   : > { %p64_p3 = scmp.ne.s32.totalorder %s1526_s13, %s1522_s12  ;;  %p2314_p4 = scmp.eq.s32.totalorder %s1593_s16, 0 }
   0xd   : > { %s1609_s21 = scalar_select %p49_p1, %s1530_s14, %s51_s19  }
   0xe   : > { %p1611_p5 = por %p59_p2, %p58_p0  ;;  %p1617_p6 = por %p2314_p4, %p64_p3 }
   0xf   : > { %p114_p7 = scmp.eq.s32.totalorder %s1593_s16, 1  ;;  %p120_p8 = scmp.eq.s32.totalorder %s1201_s17, 1 }
  0x10   : > { %s2318_s23 = scalar_select %p1617_p6, 1, 0 }
  0x11   : > { %p1202_p9 = scmp.ge.s32.totalorder %s1534_s15, 1  ;;  %p127_p10 = scmp.lt.s32.totalorder %s1534_s15, 3 }
  0x12   : > { %p1624_p11 = por %p114_p7, %p58_p0  ;;  %p1628_p12 = por %p120_p8, %p64_p3 }
  0x13   : > { %p1632_p13 = pnand %p1202_p9, %p127_p10  ;;  %p1319_p4 = scmp.lt.s32.totalorder %s1534_s15, 2 }
  0x14   : > { %s2319_s24 = scalar_select %p1624_p11, 1, 0 }
  0x15   : > { %s2320_s25 = scalar_select %p1628_p12, 1, 0 }
  0x16   : > { %p1303_p2 = pneg %p1632_p13  ;;  %s1641_s27 = sand.u32 1, %s1530_s14  }
  0x17   : > { %s1244_s28 = sshll.u32 %s1534_s15, 10  ;;  %p2322_p0 = scmp.eq.s32.totalorder %s1593_s16, 0 }
  0x18   : > { %p1648_p3 = pnand %p1319_p4, %p1611_p5  ;;  %s1205_s30 = sshll.u32 %s1641_s27, 6 }
  0x19   : > { %p1304_p7 = pnand %p1303_p2, %p2322_p0  ;;  %s1387_s6 = scalar_lea.hbm %s2310_s0, 16 }
  0x1a   : > { %p1388_p8 = scmp.ne.s32.totalorder %s2310_s0, %s1387_s6  ;;  %p1394_p2 = scmp.lt.u32.totalorder %s1387_s6, %s2310_s0 }
  0x1b   : > { %p1389_p9 = pneg %p1304_p7 }
  0x1d   : > { %p1390_p10 = pnand %p1389_p9, %p1388_p8 }
  0x1f   : > { %p1391_p1 = pneg %p1390_p10 }
  0x21   : > { %p1396_p4 = pnand %p1394_p2, %p1391_p1 }
  0x23   : > { %1399 = shalt.err (!%p1396_p4)
}
  0x24   : > { %s1536_s11 = smov [#allocation4]   ;;  %s1668_s4 = scalar_lea.hbm %s2311_s1, %s1244_s28 }
  0x25   : > { %1306 = dma.hbm_to_smem (!%p1304_p7), %s2310_s0, 16, %s1536_s11, [#allocation7]  }
  0x26   : > { %s153_s5 = scalar_lea.vmem [#allocation8], %s1205_s30  ;;  %s150_s7 = scalar_lea.sflag [#allocation5], %s1641_s27 }
  0x27   : > { %s160_s6 = sshll.u32 %s153_s5, 4  ;;  %s1400_s8 = scalar_lea.hbm %s1668_s4, 1024  ;;  %s1670_s6 = int_to_ptr.vmem [resolvable:$true] %s160_s6 }
  0x28   : > { %p1401_p5 = scmp.ne.s32.totalorder %s1668_s4, %s1400_s8  ;;  %p1402_p1 = pneg %p1648_p3 }
  0x29   : > { %s1405_s10 = scalar_lea.hbm %s2311_s1, 2048  ;;  %p1406_p8 = scmp.lt.u32.totalorder %s1668_s4, %s2311_s1 }
  0x2a   : > { %p1403_p0 = pnand %p1402_p1, %p1401_p5  ;;  %p1407_p9 = scmp.lt.u32.totalorder %s1405_s10, %s1400_s8 }
  0x2b   : > { %p1409_p2 = scmp.lt.u32.totalorder %s1400_s8, %s1668_s4 }
  0x2c   : > { %p1404_p7 = pneg %p1403_p0  ;;  %p1408_p10 = por %p1407_p9, %p1406_p8 }
  0x2e   : > { %p1410_p4 = por %p1409_p2, %p1408_p10 }
  0x30   : > { %p1411_p12 = pnand %p1410_p4, %p1404_p7 }
  0x32   : > { %1414 = shalt.err (!%p1411_p12)
}
  0x33   : > { %s1415_s30 = scalar_lea.vmem %s1670_s6, 1024  ;;  %s1537_s19 = smov [#allocation8]  }
  0x34   : > { %p1416_p5 = scmp.ne.s32.totalorder %s1670_s6, %s1415_s30  ;;  %s1420_s20 = sshll.u32 %s1537_s19, 4  ;;  %s1421_s20 = int_to_ptr.vmem [resolvable:$false] %s1420_s20 }
  0x35   : > { %s1422_s22 = scalar_lea.vmem %s1421_s20, 2048  ;;  %p1423_p6 = scmp.lt.s32.totalorder %s1670_s6, %s1421_s20 }
  0x36   : > { %p1418_p0 = pnand %p1416_p5, %p1402_p1  ;;  %p1424_p8 = scmp.lt.s32.totalorder %s1422_s22, %s1415_s30 }
  0x38   : > { %p1419_p11 = pneg %p1418_p0  ;;  %p1425_p9 = por %p1424_p8, %p1423_p6 }
  0x3a   : > { %p1426_p10 = pnand %p1425_p9, %p1419_p11 }
  0x3c   : > { %1429 = shalt.err (!%p1426_p10)
}
  0x3d   : > { %s1538_s5 = smov 128   ;;  %s1539_s8 = smov 8  }
  0x3e   : > { %1310 = dma.hbm_to_vmem [thread:$0]  (!%p1648_p3), %s1668_s4, 1024, %s1670_s6, %s150_s7, %s1538_s5, %s1538_s5, %s1539_s8  }
  0x3f   : > { %s1208_s9 = sshll.u32 %s1641_s27, 4  ;;  %s1245_s28 = sshll.u32 %s1534_s15, 8 }
  0x40   : > { %s1708_s17 = scalar_lea.hbm %s2312_s2, %s1245_s28  ;;  %s174_s30 = scalar_lea.vmem [#allocation9], %s1208_s9 }
  0x41   : > { %s181_s19 = sshll.u32 %s174_s30, 4  ;;  %s171_s20 = scalar_lea.sflag [#allocation10], %s1641_s27  ;;  %s1710_s19 = int_to_ptr.vmem [resolvable:$true] %s181_s19 }
  0x42   : > { %s1430_s22 = scalar_lea.hbm %s1708_s17, 256  ;;  %s1435_s7 = scalar_lea.hbm %s2312_s2, 512 }
  0x43   : > { %p1431_p6 = scmp.ne.s32.totalorder %s1708_s17, %s1430_s22  ;;  %p1436_p7 = scmp.lt.u32.totalorder %s1708_s17, %s2312_s2 }
  0x44   : > { %p1437_p2 = scmp.lt.u32.totalorder %s1435_s7, %s1430_s22  ;;  %p1439_p5 = scmp.lt.u32.totalorder %s1430_s22, %s1708_s17 }
  0x45   : > { %p1433_p11 = pnand %p1431_p6, %p1402_p1 }
  0x46   : > { %p1438_p4 = por %p1437_p2, %p1436_p7 }
  0x47   : > { %p1434_p12 = pneg %p1433_p11 }
  0x48   : > { %p1440_p0 = por %p1439_p5, %p1438_p4 }
  0x4a   : > { %p1441_p8 = pnand %p1440_p0, %p1434_p12 }
  0x4c   : > { %1444 = shalt.err (!%p1441_p8)
}
  0x4d   : > { %s1445_s9 = scalar_lea.vmem %s1710_s19, 256  ;;  %s1540_s11 = smov [#allocation9]  }
  0x4e   : > { %p1446_p9 = scmp.ne.s32.totalorder %s1710_s19, %s1445_s9  ;;  %s1450_s30 = sshll.u32 %s1540_s11, 4  ;;  %s1451_s30 = int_to_ptr.vmem [resolvable:$false] %s1450_s30 }
  0x4f   : > { %s1452_s4 = scalar_lea.vmem %s1451_s30, 512  ;;  %p1453_p11 = scmp.lt.s32.totalorder %s1710_s19, %s1451_s30 }
  0x50   : > { %p1448_p10 = pnand %p1446_p9, %p1402_p1  ;;  %p1454_p7 = scmp.lt.s32.totalorder %s1452_s4, %s1445_s9 }
  0x52   : > { %p1449_p6 = pneg %p1448_p10  ;;  %p1455_p2 = por %p1454_p7, %p1453_p11 }
  0x54   : > { %p1456_p4 = pnand %p1455_p2, %p1449_p6 }
  0x56   : > { %1459 = shalt.err (!%p1456_p4)
}
  0x57   : > { %1313 = dma.hbm_to_vmem [thread:$0]  (!%p1648_p3), %s1708_s17, 256, %s1710_s19, %s171_s20, %s1538_s5, %s1538_s5, %s1539_s8  }
  0x58   : > { %193 = sbr.rel (%p1632_p13) target bundleno = 1091 (0x443), region = 32  ;;  %p2324_p1 = scmp.eq.s32.totalorder (!%p1632_p13), %s1593_s16, 0 }
  0x5f   : > { %1505 = dma.done.wait (%p2324_p1), [#allocation7], 16   ;;  %p2325_p12 = pmov %p2324_p1 }
  0x60   : > { %s1748_s29 = sand.u32 1, %s1526_s13   ;;  %p2326_p5 = scmp.ne.s32.totalorder %s2318_s23, 0 }
  0x61   : > { %1507 = vsyncadd (%p2325_p12), [#allocation7], 4294967280  ;;  %s1213_s22 = sshll.u32 %s1748_s29, 6  ;;  %s200_s27 = scalar_lea.sflag [#allocation5], %s1748_s29 }
  0x62   : > { %s203_s6 = scalar_lea.vmem [#allocation8], %s1213_s22 }
  0x63   : > { %1509 = dma.done.wait (%p2326_p5), %s200_s27, 1024  }
  0x64   : > { %1511 = vsyncadd (%p2326_p5), %s200_s27, 4294966272  ;;  %s1214_s26 = sshll.u32 %s1748_s29, 4  ;;  %s209_s5 = scalar_lea.sflag [#allocation10], %s1748_s29 }
  0x65   : > { %s212_s8 = scalar_lea.vmem [#allocation9], %s1214_s26 }
  0x66   : > { %1513 = dma.done.wait (%p2326_p5), %s209_s5, 256  }
  0x67   : > { %1515 = vsyncadd (%p2326_p5), %s209_s5, 4294967040 }
  0x68   : > { %217 = sfence }
  0x69   : > { %v1762_v0 = vld [vmem:[%s203_s6] sm:$0xff]  ;;  %v1764_v1 = vld [vmem:[%s203_s6 + $0x8] sm:$0xff]  ;;  %v1766_v2 = vld [vmem:[%s203_s6 + $0x10] sm:$0xff]  ;;  %s1818_s23 = sld [smem:[#allocation4]]  ;;  %vm361_vm4 = vcmask 130048   ;;  %s1824_s17 = sld [smem:[#allocation4 + $0x1]] }
  0x6a   : > { %v1768_v3 = vld [vmem:[%s203_s6 + $0x18] sm:$0xff]  ;;  %v1770_v4 = vld [vmem:[%s203_s6 + $0x20] sm:$0xff]  ;;  %v1772_v5 = vld [vmem:[%s203_s6 + $0x28] sm:$0xff]  ;;  %v262_v6 = vmax.f32 %v1762_v0, %v1766_v2  ;;  %v1541_v39 = vmov 1.0   ;;  %s1840_s19 = sld [smem:[#allocation4 + $0x2]]  ;;  %v1542_v62 = vmov 0.0  }
  0x6b   : > { %v1776_v7 = vld [vmem:[%s203_s6 + $0x30] sm:$0xff]  ;;  %v263_v8 = vmax.f32 %v1764_v1, %v1768_v3  ;;  %v1780_v9 = vld [vmem:[%s203_s6 + $0x38] sm:$0xff]  ;;  %1289 = vmatprep.subr.bf16.mxu1 %v1542_v62  ;;  %s1855_s20 = sld [smem:[#allocation4 + $0x3]]  ;;  %s1543_s7 = smov 16  }
  0x6c   : > { %v264_v10 = vmax.f32 %v262_v6, %v1770_v4  ;;  %v1784_v12 = vld [vmem:[%s212_s8] sm:$0xff]  ;;  %v1789_v14 = vld [vmem:[%s212_s8 + $0x8] sm:$0xff]  ;;  %s1544_s28 = smov 32   ;;  %s1545_s10 = smov 64  }
  0x6d   : > { %v265_v11 = vmax.f32 %v263_v8, %v1772_v5  ;;  %vm252_vm0 = vcmp.gt.s32.totalorder %v1784_v12, 0  ;;  %vm254_vm1 = vcmp.gt.s32.totalorder %v1789_v14, 0  ;;  %vm260_vm13 = vcmp.ne.s32.totalorder %v1784_v12, 4294967196  ;;  %s1546_s9 = smov 80   ;;  %s1547_s11 = smov 96  }
  0x6e   : > { %v1787_v13 = vmax.f32 %v264_v10, %v1776_v7  ;;  %v253_v29 = vsel %vm252_vm0, %v1784_v12, 0  ;;  %v255_v30 = vsel %vm254_vm1, %v1789_v14, 0  ;;  %vm261_vm14 = vcmp.ne.s32.totalorder %v1789_v14, 4294967196  ;;  %s1548_s30 = smov 48   ;;  %s1549_s4 = smov 112  }
  0x6f   : > { %v1792_v15 = vmax.f32 %v265_v11, %v1780_v9  ;;  %vm256_vm2 = vcmp.lt.s32.totalorder %v253_v29, 3  ;;  %vm258_vm3 = vcmp.lt.s32.totalorder %v255_v30, 3  ;;  %v311_v6 = vstv %s1818_s23  ;;  %s1215_s22 = sshll.u32 %s1748_s29, 3  ;;  %s1241_s26 = sshll.u32 %s1593_s16, 7 }
  0x70   : > { %v268_v16 = vsub.f32 %v1762_v0, %v1787_v13  ;;  %v274_v17 = vsub.f32 %v1766_v2, %v1787_v13  ;;  %v282_v18 = vsub.f32 %v1770_v4, %v1787_v13  ;;  %v290_v24 = vsub.f32 %v1776_v7, %v1787_v13  ;;  %s240_s27 = scalar_lea.vmem [#allocation11], %s1215_s22  ;;  %p2327_p3 = scmp.ne.s32.totalorder %s2319_s24, 0 }
  0x71   : > { %v269_v19 = vsub.f32 %v1764_v1, %v1792_v15  ;;  %v275_v20 = vsub.f32 %v1768_v3, %v1792_v15  ;;  %v283_v21 = vsub.f32 %v1772_v5, %v1792_v15  ;;  %v291_v27 = vsub.f32 %v1780_v9, %v1792_v15  ;;  %s1096_s6 = sshll.u32 %s240_s27, 4  ;;  %s1551_s16 = smov [#allocation11]   ;;  %s2263_s6 = int_to_ptr.vmem [resolvable:$true] %s1096_s6 }
  0x72   : > { %v270_v22 = vmul.f32 1.442695, %v268_v16  ;;  %v276_v23 = vmul.f32 1.442695, %v274_v17  ;;  %v284_v28 = vmul.f32 1.442695, %v282_v18  ;;  %v323_v8 = vstv %s1824_s17  ;;  %s2268_s17 = scalar_lea.hbm %s2313_s3, %s1241_s26 }
  0x73   : > { %v272_v25 = vmul.f32 1.442695, %v269_v19  ;;  %v278_v26 = vmul.f32 1.442695, %v275_v20  ;;  %v286_v31 = vmul.f32 1.442695, %v283_v21  ;;  %v450_v19 = vlaneseq }
  0x74   : > { %1367 = vpow2.f32 %v270_v22  ;;  %v292_v32 = vmul.f32 1.442695, %v290_v24  ;;  %v294_v33 = vmul.f32 1.442695, %v291_v27  ;;  %v1814_v34 = vsel %vm256_vm2, %v253_v29, 3 }
  0x75   : > { %1369 = vpow2.f32 %v272_v25  ;;  %v1816_v35 = vsel %vm258_vm3, %v255_v30, 3  ;;  %vm304_vm5 = vcmp.eq.s32.totalorder %v1814_v34, 0  ;;  %vm316_vm7 = vcmp.eq.s32.totalorder %v1814_v34, 1 }
  0x76   : > { %1371 = vpow2.f32 %v276_v23  ;;  %vm305_vm6 = vcmp.eq.s32.totalorder %v1816_v35, 0  ;;  %vm317_vm8 = vcmp.eq.s32.totalorder %v1816_v35, 1  ;;  %vm328_vm9 = vcmp.eq.s32.totalorder %v1814_v34, 2 }
  0x77   : > { %1373 = vpow2.f32 %v278_v26  ;;  %vm329_vm10 = vcmp.eq.s32.totalorder %v1816_v35, 2  ;;  %vm340_vm11 = vcmp.eq.s32.totalorder %v1814_v34, 3  ;;  %vm341_vm12 = vcmp.eq.s32.totalorder %v1816_v35, 3 }
  0x78   : > { %1375 = vpow2.f32 %v284_v28  ;;  %v358_v40 = vsel %vm304_vm5, 0.0, %v1541_v39  ;;  %v359_v41 = vsel %vm305_vm6, 0.0, %v1541_v39  ;;  %v378_v42 = vsel %vm316_vm7, 0.0, %v1541_v39 }
  0x79   : > { %1377 = vpow2.f32 %v286_v31  ;;  %v379_v43 = vsel %vm317_vm8, 0.0, %v1541_v39  ;;  %v360_v46 = vpack.c.bf16 %v359_v41, %v358_v40  ;;  %v402_v48 = vsel %vm328_vm9, 0.0, %v1541_v39 }
  0x7a   : > { %1379 = vpow2.f32 %v292_v32  ;;  %v380_v47 = vpack.c.bf16 %v379_v43, %v378_v42  ;;  %v403_v51 = vsel %vm329_vm10, 0.0, %v1541_v39  ;;  %v426_v52 = vsel %vm340_vm11, 0.0, %v1541_v39 }
  0x7b   : > { %1381 = vpow2.f32 %v294_v33  ;;  %v427_v53 = vsel %vm341_vm12, 0.0, %v1541_v39  ;;  %362 = vst.msk [vmem:[#allocation2] sm:$0xff] %vm361_vm4, %v360_v46  ;;  %v404_v56 = vpack.c.bf16 %v403_v51, %v402_v48  ;;  %v306_v10 = vsel %vm304_vm5, %v1762_v0, 0.0 }
  0x7c   : > { %381 = vst.msk [vmem:[#allocation2 + $0x8] sm:$0xff] %vm361_vm4, %v380_v47  ;;  %v428_v57 = vpack.c.bf16 %v427_v53, %v426_v52  ;;  %v318_v11 = vsel %vm316_vm7, %v1766_v2, 0.0  ;;  %v307_v16 = vsel %vm305_vm6, %v1764_v1, 0.0  ;;  %v319_v17 = vsel %vm317_vm8, %v1768_v3, 0.0 }
  0x7d   : > { %405 = vst.msk [vmem:[#allocation2 + $0x10] sm:$0xff] %vm361_vm4, %v404_v56  ;;  %v312_v18 = vsel %vm304_vm5, %v311_v6, 0.0  ;;  %v324_v0 = vsel %vm316_vm7, %v323_v8, 0.0  ;;  %v313_v2 = vsel %vm305_vm6, %v311_v6, 0.0  ;;  %v320_v20 = vadd.f32 %v318_v11, %v306_v10 }
  0x7e   : > { %v1368_v36 = vpop.eup %1367  ;;  %429 = vst.msk [vmem:[#allocation2 + $0x18] sm:$0xff] %vm361_vm4, %v428_v57  ;;  %v325_v21 = vsel %vm317_vm8, %v323_v8, 0.0  ;;  %v335_v1 = vstv %s1840_s19  ;;  %v321_v22 = vadd.f32 %v319_v17, %v307_v16  ;;  %v330_v3 = vsel %vm328_vm9, %v1770_v4, 0.0  ;;  %s1083_s19 = scalar_lea.sflag [#allocation6], %s1748_s29 }
  0x7f   : > { %v1370_v37 = vpop.eup %1369  ;;  %v326_v23 = vadd.f32 %v324_v0, %v312_v18  ;;  %v331_v24 = vsel %vm329_vm10, %v1772_v5, 0.0  ;;  %v327_v25 = vadd.f32 %v325_v21, %v313_v2  ;;  %v336_v26 = vsel %vm328_vm9, %v335_v1, 0.0 }
  0x80   : > { %v1372_v38 = vpop.eup %1371  ;;  %v332_v27 = vadd.f32 %v330_v3, %v320_v20  ;;  %v337_v28 = vsel %vm329_vm10, %v335_v1, 0.0  ;;  %v347_v29 = vstv %s1855_s20  ;;  %v451_v30 = vshrl.u32 %v450_v19, 7  ;;  %s1460_s20 = scalar_lea.vmem %s2263_s6, 128 }
  0x81   : > { %v1374_v44 = vpop.eup %1373  ;;  %v280_v45 = vadd.f32 %v1372_v38, %v1368_v36  ;;  %v333_v31 = vadd.f32 %v331_v24, %v321_v22  ;;  %v342_v4 = vsel %vm340_vm11, %v1776_v7, 0.0  ;;  %v338_v32 = vadd.f32 %v336_v26, %v326_v23  ;;  %p1461_p13 = scmp.ne.s32.totalorder %s2263_s6, %s1460_s20 }
  0x82   : > { %v1376_v49 = vpop.eup %1375  ;;  %v281_v50 = vadd.f32 %v1374_v44, %v1370_v37  ;;  %v343_v5 = vsel %vm341_vm12, %v1780_v9, 0.0  ;;  %v339_v36 = vadd.f32 %v337_v28, %v327_v25  ;;  %v348_v37 = vsel %vm340_vm11, %v347_v29, 0.0 }
  0x83   : > { %v1378_v54 = vpop.eup %1377  ;;  %v288_v55 = vadd.f32 %v1376_v49, %v280_v45  ;;  %v349_v38 = vsel %vm341_vm12, %v347_v29, 0.0  ;;  %v344_v41 = vadd.f32 %v342_v4, %v332_v27  ;;  %v452_v42 = vadd.s32 8, %v451_v30  ;;  %p1462_p0 = pnand %p1461_p13, %p2327_p3 }
  0x84   : > { %v1380_v58 = vpop.eup %1379  ;;  %v289_v59 = vadd.f32 %v1378_v54, %v281_v50  ;;  %v454_v43 = vand.u32 127, %v450_v19  ;;  %v345_v7 = vadd.f32 %v343_v5, %v333_v31  ;;  %v350_v46 = vadd.f32 %v348_v37, %v338_v32 }
  0x85   : > { %v1382_v60 = vpop.eup %1381  ;;  %v296_v61 = vadd.f32 %v1380_v58, %v288_v55  ;;  %v351_v47 = vadd.f32 %v349_v38, %v339_v36  ;;  %p1463_p8 = pneg %p1462_p0 }
  0x86   : > { %v297_v63 = vadd.f32 %v1382_v60, %v289_v59  ;;  %v455_v49 = vsub.s32 %v451_v30, %v454_v43  ;;  %v456_v50 = vsub.s32 %v452_v42, %v454_v43 }
  0x87   : > { %1383 = vlog2.f32 %v296_v61 }
  0x88   : > { %1385 = vlog2.f32 %v297_v63  ;;  %v458_v55 = vsub.s32 0, %v455_v49  ;;  %v461_v56 = vsub.s32 0, %v456_v50 }
  0x8a   : > { %v1931_v11 = vmin.u32 %v458_v55, %v455_v49  ;;  %v1933_v16 = vmin.u32 %v461_v56, %v456_v50 }
  0x8c   : > { %vm470_vm15 = vcmp.le.s32.totalorder %v1931_v11, 2  ;;  %vm471_vm0 = vcmp.le.s32.totalorder %v1933_v16, 2  ;;  %vm463_vm1 = vcmp.le.s32.totalorder %v1931_v11, 1  ;;  %vm464_vm2 = vcmp.le.s32.totalorder %v1933_v16, 1 }
  0x8d   : > { %v1221_v28 = vsel %vm463_vm1, 1.0, %v1542_v62  ;;  %v1222_v29 = vsel %vm464_vm2, 1.0, %v1542_v62  ;;  %v1223_v32 = vsel %vm470_vm15, 1.0, %v1542_v62  ;;  %v1224_v5 = vsel %vm471_vm0, 1.0, %v1542_v62 }
  0x8e   : > { %v1946_v4 = vpack.c.bf16 %v1222_v29, %v1221_v28  ;;  %vm477_vm3 = vcmp.le.s32.totalorder %v1931_v11, 4  ;;  %v476_v36 = vpack.c.bf16 %v1224_v5, %v1223_v32  ;;  %vm424_vm15 = vcmask 917248  }
  0x8f   : > { %v1225_v37 = vsel %vm477_vm3, 1.0, %v1542_v62  ;;  %vm442_vm0 = vcmask 523648   ;;  %vm448_vm1 = vcmask 1048448   ;;  %vm513_vm2 = vcmask 261120  }
  0x90   : > { %vm516_vm3 = vcmask 392192  }
  0x91   : > { %v1384_v33 = vpop.eup %1383 }
  0x92   : > { %v1386_v39 = vpop.eup %1385  ;;  %v299_v40 = vmul.f32 0.6931472, %v1384_v33 }
  0x93   : > { %v301_v44 = vmul.f32 0.6931472, %v1386_v39 }
  0x94   : > { %v302_v45 = vadd.f32 %v299_v40, %v1787_v13 }
  0x95   : > { %v303_v9 = vadd.f32 %v301_v44, %v1792_v15 }
  0x96   : > { %v352_v48 = vsub.f32 %v302_v45, %v344_v41  ;;  %v523_v41 = vld [vmem:[#allocation2] sm:$0xff] }
  0x97   : > { %v353_v51 = vsub.f32 %v303_v9, %v345_v7  ;;  %1259 = vmatprep.mubr.msk.bf16.mxu0 %vm361_vm4, %v523_v41 }
  0x98   : > { %v354_v52 = vmul.f32 %v352_v48, %v350_v46 }
  0x99   : > { %v355_v53 = vmul.f32 %v353_v51, %v351_v47 }
  0x9a   : > { %v1903_v54 = vsel %vm260_vm13, %v354_v52, 0.0  ;;  %vm400_vm13 = vcmask 786048  }
  0x9b   : > { %v1905_v57 = vsel %vm261_vm14, %v355_v53, 0.0  ;;  %v382_v13 = vsel %vm316_vm7, %v1903_v54, 0.0  ;;  %v406_v15 = vsel %vm328_vm9, %v1903_v54, 0.0  ;;  %v363_v12 = vsel %vm304_vm5, %v1903_v54, 0.0 }
  0x9c   : > { %v383_v14 = vsel %vm317_vm8, %v1905_v57, 0.0  ;;  %v407_v58 = vsel %vm329_vm10, %v1905_v57, 0.0  ;;  %v364_v59 = vsel %vm305_vm6, %v1905_v57, 0.0  ;;  %v430_v60 = vsel %vm340_vm11, %v1903_v54, 0.0 }
  0x9d   : > { %v384_v61 = vpack.c.bf16 %v383_v14, %v382_v13  ;;  %v408_v63 = vpack.c.bf16 %v407_v58, %v406_v15  ;;  %v365_v6 = vpack.c.bf16 %v364_v59, %v363_v12  ;;  %v431_v8 = vsel %vm341_vm12, %v1905_v57, 0.0 }
  0x9e   : > { %v432_v10 = vpack.c.bf16 %v431_v8, %v430_v60  ;;  %vm478_vm5 = vcmp.le.s32.totalorder %v1933_v16, 4  ;;  %vm484_vm6 = vcmp.le.s32.totalorder %v1931_v11, 8  ;;  %vm485_vm7 = vcmp.le.s32.totalorder %v1933_v16, 8 }
  0x9f   : > { %391 = vrot.lane.b32.xlu0 %v384_v61, %s1543_s7  ;;  %415 = vrot.lane.b32.xlu1 %v408_v63, %s1544_s28  ;;  %v366_v34 = vunpack.c.l.bf16 %v365_v6  ;;  %v367_v17 = vunpack.c.h.bf16 %v365_v6  ;;  %371 = vst.msk [vmem:[#allocation3] sm:$0xff] %vm361_vm4, %v365_v6  ;;  %v385_v18 = vunpack.c.l.bf16 %v384_v61  ;;  %v386_v0 = vunpack.c.h.bf16 %v384_v61  ;;  %v526_v61 = vld [vmem:[#allocation2 + $0x18] sm:$0xff] }
  0xa0   : > { %v409_v19 = vunpack.c.l.bf16 %v408_v63  ;;  %v410_v35 = vunpack.c.h.bf16 %v408_v63  ;;  %v433_v2 = vunpack.c.l.bf16 %v432_v10  ;;  %v434_v20 = vunpack.c.h.bf16 %v432_v10 }
  0xa1   : > { %v368_v21 = vsub.f32 %v363_v12, %v366_v34  ;;  %v369_v1 = vsub.f32 %v364_v59, %v367_v17  ;;  %v387_v22 = vsub.f32 %v382_v13, %v385_v18  ;;  %v388_v3 = vsub.f32 %v383_v14, %v386_v0  ;;  %v524_v59 = vld [vmem:[#allocation2 + $0x8] sm:$0xff] }
  0xa2   : > { %v411_v23 = vsub.f32 %v406_v15, %v409_v19  ;;  %v412_v24 = vsub.f32 %v407_v58, %v410_v35  ;;  %v435_v27 = vsub.f32 %v430_v60, %v433_v2  ;;  %v436_v31 = vsub.f32 %v431_v8, %v434_v20  ;;  %v525_v60 = vld [vmem:[#allocation2 + $0x10] sm:$0xff] }
  0xa3   : > { %v370_v25 = vpack.c.bf16 %v369_v1, %v368_v21  ;;  %v389_v26 = vpack.c.bf16 %v388_v3, %v387_v22  ;;  %v1226_v38 = vsel %vm478_vm5, 1.0, %v1542_v62  ;;  %v1227_v39 = vsel %vm484_vm6, 1.0, %v1542_v62 }
  0xa4   : > { %v413_v30 = vpack.c.bf16 %v412_v24, %v411_v23  ;;  %v437_v33 = vpack.c.bf16 %v436_v31, %v435_v27  ;;  %v1228_v40 = vsel %vm485_vm7, 1.0, %v1542_v62  ;;  %vm491_vm8 = vcmp.le.s32.totalorder %v1931_v11, 16 }
  0xa5   : > { %373 = vrot.lane.b32.xlu0 %v370_v25, %s1545_s10  ;;  %397 = vrot.lane.b32.xlu1 %v389_v26, %s1546_s9  ;;  %vm492_vm9 = vcmp.le.s32.totalorder %v1933_v16, 16  ;;  %v483_v42 = vpack.c.bf16 %v1226_v38, %v1225_v37  ;;  %v490_v43 = vpack.c.bf16 %v1228_v40, %v1227_v39  ;;  %v1229_v44 = vsel %vm491_vm8, 1.0, %v1542_v62 }
  0xa6   : > { %v1230_v7 = vsel %vm492_vm9, 1.0, %v1542_v62  ;;  %vm1550_vm10 = vmmov 0   ;;  %vm376_vm11 = vcmask 654848   ;;  %vm394_vm12 = vcmask 261248  }
  0xa7   : > { %v497_v45 = vpack.c.bf16 %v1230_v7, %v1229_v44  ;;  %1273 = vmatprep.mubr.msk.bf16.mxu1 %vm1550_vm10, %v1542_v62  ;;  %vm418_vm14 = vcmask 392448   ;;  %vm519_vm5 = vcmask 523264  }
  0xa9   : > { %421 = vrot.lane.b32.xlu0 %v413_v30, %s1547_s11  ;;  %439 = vrot.lane.b32.xlu1 %v432_v10, %s1548_s30 }
  0xad   : > { %445 = vrot.lane.b32.xlu0 %v437_v33, %s1549_s4  ;;  %499 = vrot.lane.b32.xlu1 %v476_v36, %s1543_s7 }
  0xb1   : > { %502 = vrot.lane.b32.xlu0 %v483_v42, %s1544_s28  ;;  %505 = vrot.lane.b32.xlu1 %v490_v43, %s1548_s30 }
  0xb5   : > { %508 = vrot.lane.b32.xlu0 %v497_v45, %s1545_s10 }
 0x111   : > { %v392_v46 = vpop.permute.xlu0 %391  ;;  %v416_v9 = vpop.permute.xlu1 %415 }
 0x117   : > { %v374_v47 = vpop.permute.xlu0 %373  ;;  %v398_v48 = vpop.permute.xlu1 %397 }
 0x118   : > { %377 = vst.msk [vmem:[#allocation3] sm:$0xff] %vm376_vm11, %v374_v47 }
 0x119   : > { %395 = vst.msk [vmem:[#allocation3] sm:$0xff] %vm394_vm12, %v392_v46 }
 0x11a   : > { %401 = vst.msk [vmem:[#allocation3] sm:$0xff] %vm400_vm13, %v398_v48 }
 0x11b   : > { %419 = vst.msk [vmem:[#allocation3] sm:$0xff] %vm418_vm14, %v416_v9  ;;  %v422_v49 = vpop.permute.xlu0 %421  ;;  %v440_v50 = vpop.permute.xlu1 %439 }
 0x11c   : > { %425 = vst.msk [vmem:[#allocation3] sm:$0xff] %vm424_vm15, %v422_v49 }
 0x11d   : > { %443 = vst.msk [vmem:[#allocation3] sm:$0xff] %vm442_vm0, %v440_v50 }
 0x11f   : > { %v446_v51 = vpop.permute.xlu0 %445  ;;  %v500_v52 = vpop.permute.xlu1 %499 }
 0x120   : > { %449 = vst.msk [vmem:[#allocation3] sm:$0xff] %vm448_vm1, %v446_v51  ;;  %v512_v53 = vsel %vm361_vm4, %v1946_v4, %v500_v52 }
 0x123   : > { %v503_v55 = vpop.permute.xlu0 %502  ;;  %v506_v13 = vpop.permute.xlu1 %505 }
 0x124   : > { %v515_v56 = vsel %vm513_vm2, %v512_v53, %v503_v55 }
 0x125   : > { %v518_v15 = vsel %vm516_vm3, %v515_v56, %v506_v13 }
 0x127   : > { %v509_v12 = vpop.permute.xlu0 %508  ;;  %v604_v14 = vld [vmem:[#allocation3] sm:$0xff] }
 0x128   : > { %1290 = vmatpush3.bf16.msra.mxu1 %v604_v14  ;;  %v521_v58 = vsel %vm519_vm5, %v518_v15, %v509_v12 }
 0x129   : > { %1257 = vmatprep.subr.bf16.mxu0 %v521_v58 }
 0x12a   : > { %1258 = vmatpush3.bf16.msra.mxu0 %v521_v58 }
 0x12b   : > { %1267 = vmatprep.subr.bf16.mxu0 %v1542_v62  ;;  %1274 = vmatmul.mubr.msk.bf16.vlgmr.msra.gmra.mrb[0].mxu1 %vm361_vm4, %v476_v36 }
 0x12c   : > { %1277 = vmatprep.mubr.msk.bf16.mxu1 %vm1550_vm10, %v1542_v62 }
 0x12d   : > { %1260 = vmatmul.mubr.msk.bf16.vlgmr.msra.gmra.mrb[0].mxu0 %vm361_vm4, %v524_v59 }
 0x12e   : > { %1268 = vmatpush3.bf16.msra.mxu0 %v604_v14  ;;  %1263 = vmatprep.mubr.msk.bf16.mxu0 %vm361_vm4, %v525_v60 }
 0x133   : > { %1278 = vmatmul.mubr.msk.bf16.gmra.mrb[4].mxu1 %vm361_vm4, %v483_v42 }
 0x134   : > { %1281 = vmatprep.mubr.msk.bf16.mxu1 %vm1550_vm10, %v1542_v62 }
 0x135   : > { %1264 = vmatmul.mubr.msk.bf16.gmra.mrb[4].mxu0 %vm361_vm4, %v526_v61 }
 0x136   : > { %1269 = vmatprep.mubr.msk.bf16.mxu0 %vm1550_vm10, %v1542_v62 }
 0x13b   : > { %1282 = vmatmul.mubr.msk.bf16.gmra.mrb[8].mxu1 %vm361_vm4, %v490_v43 }
 0x13c   : > { %1285 = vmatprep.mubr.msk.bf16.mxu1 %vm1550_vm10, %v1542_v62 }
 0x13d   : > { %1270 = vmatmul.mubr.msk.bf16.vlgmr.msra.gmra.mrb[8].mxu0 %vm361_vm4, %v1946_v4 }
 0x143   : > { %1286 = vmatmul.mubr.msk.bf16.gmra.mrb[12].mxu1 %vm361_vm4, %v497_v45 }
 0x1fe   : > { %v1996_v63 = vpop.f32.mrb[0].mxu1 }
 0x1ff   : > { %v1275_v6 = vpop.f32.mrb[1].mxu1 }
 0x200   : > { %v1998_v8 = vpop.f32.mrb[0].mxu0  ;;  %v2000_v10 = vpop.f32.mrb[2].mxu1 }
 0x201   : > { %748 = vrot.lane.b32.xlu1 %v1998_v8, %s1543_s7  ;;  %v2004_v11 = vpop.f32.mrb[1].mxu0  ;;  %v1276_v16 = vpop.f32.mrb[3].mxu1 }
 0x202   : > { %v2006_v34 = vpop.f32.mrb[2].mxu0 }
 0x203   : > { %750 = vrot.lane.b32.xlu0 %v2006_v34, %s1543_s7  ;;  %v2010_v62 = vpop.f32.mrb[3].mxu0 }
 0x205   : > { %884 = vrot.lane.b32.xlu1 %v1998_v8, %s1549_s4 }
 0x206   : > { %v2014_v17 = vpop.f32.mrb[4].mxu1 }
 0x207   : > { %886 = vrot.lane.b32.xlu0 %v2006_v34, %s1549_s4  ;;  %v1279_v18 = vpop.f32.mrb[5].mxu1 }
 0x208   : > { %v2018_v0 = vpop.f32.mrb[4].mxu0  ;;  %v2020_v19 = vpop.f32.mrb[6].mxu1 }
 0x209   : > { %946 = vrot.lane.b32.xlu1 %v1998_v8, %s1547_s11  ;;  %v2024_v35 = vpop.f32.mrb[5].mxu0  ;;  %v1280_v2 = vpop.f32.mrb[7].mxu1 }
 0x20a   : > { %v2026_v20 = vpop.f32.mrb[6].mxu0 }
 0x20b   : > { %948 = vrot.lane.b32.xlu0 %v2006_v34, %s1547_s11  ;;  %v2030_v21 = vpop.f32.mrb[7].mxu0 }
 0x20d   : > { %1008 = vrot.lane.b32.xlu1 %v1998_v8, %s1546_s9 }
 0x20e   : > { %v2034_v1 = vpop.f32.mrb[8].mxu1 }
 0x20f   : > { %1010 = vrot.lane.b32.xlu0 %v2006_v34, %s1546_s9  ;;  %v1283_v22 = vpop.f32.mrb[9].mxu1 }
 0x210   : > { %v2038_v3 = vpop.f32.mrb[8].mxu0  ;;  %v2040_v23 = vpop.f32.mrb[10].mxu1 }
 0x211   : > { %812 = vrot.lane.b32.xlu1 %v2004_v11, %s1549_s4  ;;  %v1271_v24 = vpop.f32.mrb[9].mxu0  ;;  %v1284_v25 = vpop.f32.mrb[11].mxu1 }
 0x212   : > { %v2044_v26 = vpop.f32.mrb[10].mxu0 }
 0x213   : > { %814 = vrot.lane.b32.xlu0 %v2010_v62, %s1549_s4  ;;  %v1272_v27 = vpop.f32.mrb[11].mxu0 }
 0x215   : > { %874 = vrot.lane.b32.xlu1 %v2004_v11, %s1547_s11 }
 0x216   : > { %v2050_v28 = vpop.f32.mrb[12].mxu1 }
 0x217   : > { %876 = vrot.lane.b32.xlu0 %v2010_v62, %s1547_s11  ;;  %v1287_v29 = vpop.f32.mrb[13].mxu1 }
 0x218   : > { %v2054_v30 = vpop.f32.mrb[14].mxu1 }
 0x219   : > { %788 = vrot.lane.b32.xlu1 %v2018_v0, %s1548_s30  ;;  %v1288_v31 = vpop.f32.mrb[15].mxu1 }
 0x21b   : > { %790 = vrot.lane.b32.xlu0 %v2026_v20, %s1548_s30 }
 0x21d   : > { %852 = vrot.lane.b32.xlu1 %v2018_v0, %s1544_s28 }
 0x21f   : > { %854 = vrot.lane.b32.xlu0 %v2026_v20, %s1544_s28 }
 0x221   : > { %914 = vrot.lane.b32.xlu1 %v2018_v0, %s1543_s7 }
 0x223   : > { %916 = vrot.lane.b32.xlu0 %v2026_v20, %s1543_s7 }
 0x225   : > { %1044 = vrot.lane.b32.xlu1 %v2018_v0, %s1549_s4 }
 0x227   : > { %1046 = vrot.lane.b32.xlu0 %v2026_v20, %s1549_s4 }
 0x229   : > { %768 = vrot.lane.b32.xlu1 %v2024_v35, %s1544_s28 }
 0x22b   : > { %770 = vrot.lane.b32.xlu0 %v2030_v21, %s1544_s28 }
 0x22d   : > { %834 = vrot.lane.b32.xlu1 %v2024_v35, %s1543_s7 }
 0x22f   : > { %836 = vrot.lane.b32.xlu0 %v2030_v21, %s1543_s7  ;;  %s1464_s7 = sshll.u32 %s1551_s16, 4  ;;  %s1465_s7 = int_to_ptr.vmem [resolvable:$false] %s1464_s7 }
 0x230   : > { %s1466_s28 = scalar_lea.vmem %s1465_s7, 256  ;;  %p1467_p9 = scmp.lt.s32.totalorder %s2263_s6, %s1465_s7 }
 0x231   : > { %964 = vrot.lane.b32.xlu1 %v2024_v35, %s1549_s4  ;;  %p1468_p10 = scmp.lt.s32.totalorder %s1466_s28, %s1460_s20 }
 0x233   : > { %966 = vrot.lane.b32.xlu0 %v2030_v21, %s1549_s4  ;;  %p1469_p6 = por %p1468_p10, %p1467_p9 }
 0x235   : > { %1026 = vrot.lane.b32.xlu1 %v2024_v35, %s1547_s11  ;;  %p1470_p11 = pnand %p1469_p6, %p1463_p8 }
 0x237   : > { %1028 = vrot.lane.b32.xlu0 %v2030_v21, %s1547_s11 }
 0x239   : > { %702 = vrot.lane.b32.xlu1 %v2038_v3, %s1545_s10 }
 0x23b   : > { %704 = vrot.lane.b32.xlu0 %v2044_v26, %s1545_s10 }
 0x23d   : > { %706 = vrot.lane.b32.xlu1 %v1996_v63, %s1545_s10 }
 0x23f   : > { %708 = vrot.lane.b32.xlu0 %v2000_v10, %s1545_s10 }
 0x241   : > { %710 = vrot.lane.b32.xlu1 %v2014_v17, %s1545_s10 }
 0x243   : > { %712 = vrot.lane.b32.xlu0 %v2020_v19, %s1545_s10 }
 0x245   : > { %714 = vrot.lane.b32.xlu1 %v2034_v1, %s1545_s10 }
 0x247   : > { %716 = vrot.lane.b32.xlu0 %v2040_v23, %s1545_s10 }
 0x249   : > { %718 = vrot.lane.b32.xlu1 %v2050_v28, %s1545_s10 }
 0x24b   : > { %720 = vrot.lane.b32.xlu0 %v2054_v30, %s1545_s10 }
 0x24d   : > { %936 = vrot.lane.b32.xlu1 %v2004_v11, %s1546_s9 }
 0x24f   : > { %938 = vrot.lane.b32.xlu0 %v2010_v62, %s1546_s9 }
 0x251   : > { %998 = vrot.lane.b32.xlu1 %v2004_v11, %s1545_s10 }
 0x253   : > { %1000 = vrot.lane.b32.xlu0 %v2010_v62, %s1545_s10 }
 0x273   : > { %v749_v4 = vpop.permute.xlu1 %748 }
 0x275   : > { %v751_v32 = vpop.permute.xlu0 %750 }
 0x277   : > { %v885_v5 = vpop.permute.xlu1 %884 }
 0x279   : > { %v887_v33 = vpop.permute.xlu0 %886 }
 0x27b   : > { %v2116_v36 = vpop.permute.xlu1 %946 }
 0x27d   : > { %v2118_v37 = vpop.permute.xlu0 %948 }
 0x27f   : > { %v2120_v38 = vpop.permute.xlu1 %1008 }
 0x281   : > { %v2122_v39 = vpop.permute.xlu0 %1010 }
 0x283   : > { %v813_v40 = vpop.permute.xlu1 %812 }
 0x285   : > { %v815_v41 = vpop.permute.xlu0 %814 }
 0x287   : > { %v875_v42 = vpop.permute.xlu1 %874 }
 0x289   : > { %v877_v43 = vpop.permute.xlu0 %876 }
 0x28b   : > { %v2124_v44 = vpop.permute.xlu1 %788 }
 0x28d   : > { %v2126_v7 = vpop.permute.xlu0 %790 }
 0x28f   : > { %v2128_v45 = vpop.permute.xlu1 %852 }
 0x291   : > { %v2130_v46 = vpop.permute.xlu0 %854 }
 0x293   : > { %v2132_v9 = vpop.permute.xlu1 %914 }
 0x295   : > { %v2134_v47 = vpop.permute.xlu0 %916 }
 0x297   : > { %v1045_v48 = vpop.permute.xlu1 %1044 }
 0x299   : > { %v2136_v49 = vpop.permute.xlu0 %1046 }
 0x29b   : > { %v769_v50 = vpop.permute.xlu1 %768 }
 0x29d   : > { %v771_v51 = vpop.permute.xlu0 %770 }
 0x29f   : > { %v835_v52 = vpop.permute.xlu1 %834 }
 0x2a1   : > { %v837_v53 = vpop.permute.xlu0 %836 }
 0x2a3   : > { %v2138_v55 = vpop.permute.xlu1 %964 }
 0x2a5   : > { %v2140_v56 = vpop.permute.xlu0 %966 }
 0x2a7   : > { %v2142_v13 = vpop.permute.xlu1 %1026 }
 0x2a9   : > { %v2144_v15 = vpop.permute.xlu0 %1028 }
 0x2ab   : > { %v703_v12 = vpop.permute.xlu1 %702 }
 0x2ac   : > { %v732_v14 = vadd.f32 %v703_v12, %v2038_v3 }
 0x2ad   : > { %v705_v58 = vpop.permute.xlu0 %704 }
 0x2ae   : > { %v733_v59 = vadd.f32 %v705_v58, %v2044_v26  ;;  %v754_v60 = vmul.f32 %v749_v4, %v732_v14  ;;  %v2149_v6 = vmul.f32 %v732_v14, %v2004_v11 }
 0x2af   : > { %v707_v61 = vpop.permute.xlu1 %706 }
 0x2b0   : > { %v734_v16 = vadd.f32 %v707_v61, %v1996_v63  ;;  %758 = vrot.lane.b32.xlu1 %v754_v60, %s1549_s4  ;;  %v755_v18 = vmul.f32 %v751_v32, %v733_v59  ;;  %v2154_v22 = vmul.f32 %v733_v59, %v2010_v62 }
 0x2b1   : > { %v709_v2 = vpop.permute.xlu0 %708 }
 0x2b2   : > { %v735_v24 = vadd.f32 %v709_v2, %v2000_v10  ;;  %760 = vrot.lane.b32.xlu0 %v755_v18, %s1549_s4  ;;  %v822_v3 = vmul.f32 %v1998_v8, %v734_v16  ;;  %v2159_v26 = vmul.f32 %v813_v40, %v734_v16  ;;  %v774_v10 = vmul.f32 %v769_v50, %v732_v14 }
 0x2b3   : > { %v711_v25 = vpop.permute.xlu1 %710 }
 0x2b4   : > { %v736_v11 = vadd.f32 %v711_v25, %v2014_v17  ;;  %826 = vrot.lane.b32.xlu1 %v822_v3, %s1549_s4  ;;  %v823_v63 = vmul.f32 %v2006_v34, %v735_v24  ;;  %v2164_v29 = vmul.f32 %v815_v41, %v735_v24  ;;  %v775_v34 = vmul.f32 %v771_v51, %v733_v59 }
 0x2b5   : > { %v713_v27 = vpop.permute.xlu0 %712 }
 0x2b6   : > { %v737_v62 = vadd.f32 %v713_v27, %v2020_v19  ;;  %828 = vrot.lane.b32.xlu0 %v823_v63, %s1549_s4  ;;  %v890_v31 = vmul.f32 %v885_v5, %v736_v11  ;;  %v902_v8 = vmul.f32 %v736_v11, %v2024_v35  ;;  %v2169_v32 = vmul.f32 %v875_v42, %v736_v11 }
 0x2b7   : > { %v715_v4 = vpop.permute.xlu1 %714  ;;  %v840_v35 = vmul.f32 %v835_v52, %v734_v16 }
 0x2b8   : > { %v2172_v17 = vadd.f32 %v715_v4, %v2034_v1  ;;  %778 = vrot.lane.b32.xlu1 %v774_v10, %s1547_s11  ;;  %v891_v40 = vmul.f32 %v887_v33, %v737_v62  ;;  %v903_v41 = vmul.f32 %v737_v62, %v2030_v21  ;;  %v2176_v19 = vmul.f32 %v877_v43, %v737_v62 }
 0x2b9   : > { %v717_v12 = vpop.permute.xlu0 %716  ;;  %v841_v21 = vmul.f32 %v837_v53, %v735_v24  ;;  %v858_v53 = vmul.f32 %v2128_v45, %v734_v16 }
 0x2ba   : > { %v2179_v50 = vadd.f32 %v717_v12, %v2040_v23  ;;  %780 = vrot.lane.b32.xlu0 %v775_v34, %s1547_s11  ;;  %v952_v5 = vmul.f32 %v2116_v36, %v2172_v17  ;;  %v982_v1 = vmul.f32 %v2018_v0, %v2172_v17  ;;  %v794_v0 = vmul.f32 %v2124_v44, %v732_v14 }
 0x2bb   : > { %v719_v42 = vpop.permute.xlu1 %718  ;;  %v921_v44 = vmul.f32 %v2134_v47, %v737_v62 }
 0x2bc   : > { %v2187_v33 = vadd.f32 %v719_v42, %v2050_v28  ;;  %844 = vrot.lane.b32.xlu1 %v840_v35, %s1547_s11  ;;  %v953_v23 = vmul.f32 %v2118_v37, %v2179_v50  ;;  %v983_v43 = vmul.f32 %v2026_v20, %v2179_v50  ;;  %v795_v37 = vmul.f32 %v2126_v7, %v733_v59 }
 0x2bd   : > { %v721_v51 = vpop.permute.xlu0 %720  ;;  %v970_v7 = vmul.f32 %v2138_v55, %v2172_v17  ;;  %v971_v45 = vmul.f32 %v2140_v56, %v2179_v50 }
 0x2be   : > { %v2195_v52 = vadd.f32 %v721_v51, %v2054_v30  ;;  %846 = vrot.lane.b32.xlu0 %v841_v21, %s1547_s11  ;;  %v1014_v28 = vmul.f32 %v2120_v38, %v2187_v33  ;;  %v1050_v36 = vmul.f32 %v1045_v48, %v2187_v33  ;;  %v859_v38 = vmul.f32 %v2130_v46, %v735_v24 }
 0x2bf   : > { %v1032_v46 = vmul.f32 %v2142_v13, %v2187_v33  ;;  %v937_v47 = vpop.permute.xlu1 %936 }
 0x2c0   : > { %798 = vrot.lane.b32.xlu1 %v794_v0, %s1546_s9  ;;  %v1015_v20 = vmul.f32 %v2122_v39, %v2195_v52  ;;  %v1051_v30 = vmul.f32 %v2136_v49, %v2195_v52  ;;  %v920_v39 = vmul.f32 %v2132_v9, %v736_v11  ;;  %v1033_v9 = vmul.f32 %v2144_v15, %v2195_v52 }
 0x2c1   : > { %v939_v48 = vpop.permute.xlu0 %938 }
 0x2c2   : > { %800 = vrot.lane.b32.xlu0 %v795_v37, %s1546_s9 }
 0x2c3   : > { %v2241_v49 = vpop.permute.xlu1 %998 }
 0x2c4   : > { %862 = vrot.lane.b32.xlu1 %v858_v53, %s1546_s9 }
 0x2c5   : > { %v2243_v55 = vpop.permute.xlu0 %1000 }
 0x2c6   : > { %864 = vrot.lane.b32.xlu0 %v859_v38, %s1546_s9 }
 0x2c8   : > { %894 = vrot.lane.b32.xlu1 %v890_v31, %s1549_s4 }
 0x2ca   : > { %896 = vrot.lane.b32.xlu0 %v891_v40, %s1549_s4 }
 0x2cc   : > { %906 = vrot.lane.b32.xlu1 %v902_v8, %s1547_s11 }
 0x2ce   : > { %908 = vrot.lane.b32.xlu0 %v903_v41, %s1547_s11 }
 0x2d0   : > { %924 = vrot.lane.b32.xlu1 %v920_v39, %s1546_s9 }
 0x2d2   : > { %926 = vrot.lane.b32.xlu0 %v921_v44, %s1546_s9  ;;  %v942_v44 = vmul.f32 %v937_v47, %v2172_v17  ;;  %v1004_v17 = vmul.f32 %v2241_v49, %v2187_v33 }
 0x2d4   : > { %956 = vrot.lane.b32.xlu1 %v952_v5, %s1549_s4 }
 0x2d6   : > { %958 = vrot.lane.b32.xlu0 %v953_v23, %s1549_s4 }
 0x2d8   : > { %974 = vrot.lane.b32.xlu1 %v970_v7, %s1547_s11 }
 0x2da   : > { %976 = vrot.lane.b32.xlu0 %v971_v45, %s1547_s11 }
 0x2dc   : > { %986 = vrot.lane.b32.xlu1 %v982_v1, %s1546_s9 }
 0x2de   : > { %988 = vrot.lane.b32.xlu0 %v983_v43, %s1546_s9 }
 0x2e0   : > { %1018 = vrot.lane.b32.xlu1 %v1014_v28, %s1549_s4 }
 0x2e2   : > { %1020 = vrot.lane.b32.xlu0 %v1015_v20, %s1549_s4 }
 0x2e4   : > { %1036 = vrot.lane.b32.xlu1 %v1032_v46, %s1547_s11 }
 0x2e6   : > { %1038 = vrot.lane.b32.xlu0 %v1033_v9, %s1547_s11 }
 0x2e8   : > { %1054 = vrot.lane.b32.xlu1 %v1050_v36, %s1546_s9 }
 0x2ea   : > { %1056 = vrot.lane.b32.xlu0 %v1051_v30, %s1546_s9 }
 0x322   : > { %v759_v56 = vpop.permute.xlu1 %758 }
 0x323   : > { %v764_v16 = vadd.f32 %v759_v56, %v2149_v6 }
 0x324   : > { %v761_v14 = vpop.permute.xlu0 %760 }
 0x325   : > { %v765_v2 = vadd.f32 %v761_v14, %v2154_v22 }
 0x326   : > { %v827_v13 = vpop.permute.xlu1 %826 }
 0x327   : > { %v832_v24 = vadd.f32 %v827_v13, %v2159_v26 }
 0x328   : > { %v829_v58 = vpop.permute.xlu0 %828 }
 0x329   : > { %v833_v11 = vadd.f32 %v829_v58, %v2164_v29 }
 0x32a   : > { %v779_v59 = vpop.permute.xlu1 %778 }
 0x32b   : > { %v784_v3 = vadd.f32 %v779_v59, %v764_v16 }
 0x32c   : > { %v781_v60 = vpop.permute.xlu0 %780 }
 0x32d   : > { %v785_v63 = vadd.f32 %v781_v60, %v765_v2 }
 0x32e   : > { %v845_v61 = vpop.permute.xlu1 %844 }
 0x32f   : > { %v850_v27 = vadd.f32 %v845_v61, %v832_v24 }
 0x330   : > { %v847_v15 = vpop.permute.xlu0 %846 }
 0x331   : > { %v851_v31 = vadd.f32 %v847_v15, %v833_v11 }
 0x332   : > { %v799_v18 = vpop.permute.xlu1 %798 }
 0x333   : > { %v804_v62 = vadd.f32 %v799_v18, %v784_v3 }
 0x334   : > { %v801_v25 = vpop.permute.xlu0 %800 }
 0x335   : > { %v805_v8 = vadd.f32 %v801_v25, %v785_v63  ;;  %v806_v40 = vmul.f32 0.125, %v804_v62 }
 0x336   : > { %v863_v10 = vpop.permute.xlu1 %862 }
 0x337   : > { %v868_v4 = vadd.f32 %v863_v10, %v850_v27  ;;  %v807_v35 = vmul.f32 0.125, %v805_v8 }
 0x338   : > { %v865_v34 = vpop.permute.xlu0 %864 }
 0x339   : > { %v870_v41 = vmul.f32 0.041666668, %v868_v4  ;;  %v869_v6 = vadd.f32 %v865_v34, %v851_v31 }
 0x33a   : > { %v895_v12 = vpop.permute.xlu1 %894 }
 0x33b   : > { %v872_v22 = vadd.f32 %v870_v41, %v806_v40  ;;  %v871_v5 = vmul.f32 0.041666668, %v869_v6  ;;  %v900_v29 = vadd.f32 %v895_v12, %v2169_v32  ;;  %v943_v32 = vmul.f32 %v939_v48, %v2179_v50 }
 0x33c   : > { %v897_v26 = vpop.permute.xlu0 %896  ;;  %v1005_v50 = vmul.f32 %v2243_v55, %v2195_v52 }
 0x33d   : > { %v873_v1 = vadd.f32 %v871_v5, %v807_v35  ;;  %v901_v23 = vadd.f32 %v897_v26, %v2176_v19 }
 0x33e   : > { %v907_v42 = vpop.permute.xlu1 %906 }
 0x33f   : > { %v912_v43 = vadd.f32 %v907_v42, %v900_v29 }
 0x340   : > { %v909_v21 = vpop.permute.xlu0 %908 }
 0x341   : > { %v913_v0 = vadd.f32 %v909_v21, %v901_v23 }
 0x342   : > { %v925_v51 = vpop.permute.xlu1 %924 }
 0x343   : > { %v930_v28 = vadd.f32 %v925_v51, %v912_v43 }
 0x344   : > { %v927_v36 = vpop.permute.xlu0 %926 }
 0x345   : > { %v932_v37 = vmul.f32 0.0125, %v930_v28  ;;  %v931_v20 = vadd.f32 %v927_v36, %v913_v0 }
 0x346   : > { %v957_v30 = vpop.permute.xlu1 %956 }
 0x347   : > { %v934_v53 = vadd.f32 %v932_v37, %v872_v22  ;;  %v933_v38 = vmul.f32 0.0125, %v931_v20  ;;  %v962_v46 = vadd.f32 %v957_v30, %v942_v44 }
 0x348   : > { %v959_v39 = vpop.permute.xlu0 %958 }
 0x349   : > { %v935_v7 = vadd.f32 %v933_v38, %v873_v1  ;;  %v963_v19 = vadd.f32 %v959_v39, %v943_v32 }
 0x34a   : > { %v975_v45 = vpop.permute.xlu1 %974 }
 0x34b   : > { %v980_v56 = vadd.f32 %v975_v45, %v962_v46 }
 0x34c   : > { %v977_v9 = vpop.permute.xlu0 %976 }
 0x34d   : > { %v981_v13 = vadd.f32 %v977_v9, %v963_v19 }
 0x34e   : > { %v987_v14 = vpop.permute.xlu1 %986 }
 0x34f   : > { %v992_v58 = vadd.f32 %v987_v14, %v980_v56 }
 0x350   : > { %v989_v59 = vpop.permute.xlu0 %988 }
 0x351   : > { %v994_v60 = vmul.f32 0.0034722222, %v992_v58  ;;  %v993_v61 = vadd.f32 %v989_v59, %v981_v13 }
 0x352   : > { %v1019_v15 = vpop.permute.xlu1 %1018 }
 0x353   : > { %v996_v16 = vadd.f32 %v994_v60, %v934_v53  ;;  %v995_v18 = vmul.f32 0.0034722222, %v993_v61  ;;  %v1024_v48 = vadd.f32 %v1019_v15, %v1004_v17 }
 0x354   : > { %v1021_v2 = vpop.permute.xlu0 %1020 }
 0x355   : > { %v997_v47 = vadd.f32 %v995_v18, %v935_v7  ;;  %v1025_v25 = vadd.f32 %v1021_v2, %v1005_v50 }
 0x356   : > { %v1037_v24 = vpop.permute.xlu1 %1036 }
 0x357   : > { %v1042_v11 = vadd.f32 %v1037_v24, %v1024_v48 }
 0x358   : > { %v1039_v3 = vpop.permute.xlu0 %1038 }
 0x359   : > { %v1043_v27 = vadd.f32 %v1039_v3, %v1025_v25 }
 0x35a   : > { %v1055_v63 = vpop.permute.xlu1 %1054 }
 0x35b   : > { %v1060_v62 = vadd.f32 %v1055_v63, %v1042_v11 }
 0x35c   : > { %v1057_v10 = vpop.permute.xlu0 %1056 }
 0x35d   : > { %v1062_v31 = vmul.f32 0.00091911765, %v1060_v62  ;;  %v1061_v8 = vadd.f32 %v1057_v10, %v1043_v27 }
 0x35f   : > { %v1064_v4 = vadd.f32 %v1062_v31, %v996_v16  ;;  %v1063_v34 = vmul.f32 0.00091911765, %v1061_v8 }
 0x361   : > { %v1065_v40 = vadd.f32 %v1063_v34, %v997_v47  ;;  %v1066_v33 = vadd.f32 %v1064_v4, %v1903_v54 }
 0x363   : > { %v1067_v49 = vadd.f32 %v1065_v40, %v1905_v57  ;;  %v1068_v52 = vsel %vm361_vm4, %v1066_v33, 0.0 }
 0x365   : > { %v1069_v55 = vsel %vm361_vm4, %v1067_v49, 0.0 }
 0x366   : > { %v1070_v41 = vadd.f32 %v1069_v55, %v1068_v52 }
 0x368   : > { %1071 = vadd.xlane.f32.xlu1 %v1070_v41 }
 0x3f5   : > { %v1072_v6 = vpop.xlane.xlu1 %1071 }
 0x3f6   : > { %v1073_v12 = vrot.slane %v1072_v6, 4 }
 0x3f8   : > { %v1074_v35 = vadd.f32 %v1073_v12, %v1072_v6 }
 0x3fa   : > { %v1075_v22 = vrot.slane %v1074_v35, 2 }
 0x3fc   : > { %v1076_v5 = vadd.f32 %v1075_v22, %v1074_v35 }
 0x3fe   : > { %v1077_v26 = vrot.slane %v1076_v5, 1 }
 0x400   : > { %v1078_v1 = vadd.f32 %v1077_v26, %v1076_v5 }
 0x402   : > { %1291 = vpush %v1078_v1 }
 0x433   : > { %s1292_s5 = spop %1291 }
 0x434   : > { %v1080_v54 = vstv %s1292_s5 }
 0x435   : > { %1081 = vst [vmem:[%s240_s27] sm:$0xff] %v1080_v54 }
 0x436   : > { %1473 = shalt.err (!%p1470_p11)
}
 0x437   : > { %s1474_s29 = scalar_lea.hbm %s2268_s17, 128  ;;  %s1478_s11 = scalar_lea.hbm %s2313_s3, 256 }
 0x438   : > { %p1475_p7 = scmp.ne.s32.totalorder %s2268_s17, %s1474_s29  ;;  %p1479_p1 = scmp.lt.u32.totalorder %s2268_s17, %s2313_s3 }
 0x439   : > { %p1480_p12 = scmp.lt.u32.totalorder %s1478_s11, %s1474_s29  ;;  %p1482_p13 = scmp.lt.u32.totalorder %s1474_s29, %s2268_s17 }
 0x43a   : > { %p1476_p2 = pnand %p1475_p7, %p2327_p3 }
 0x43b   : > { %p1481_p5 = por %p1480_p12, %p1479_p1 }
 0x43c   : > { %p1477_p4 = pneg %p1476_p2 }
 0x43d   : > { %p1483_p0 = por %p1482_p13, %p1481_p5 }
 0x43f   : > { %p1484_p8 = pnand %p1483_p0, %p1477_p4 }
 0x441   : > { %1487 = shalt.err (!%p1484_p8)
}
 0x442   : > { %1301 = dma.vmem_to_hbm [thread:$0]  (%p2327_p3), %s2263_s6, 128, %s2268_s17, %s1083_s19  }
 0x443 PF: > { %s1108_s22 = sand.u32 1, %s1522_s12   ;;  %p2328_p9 = scmp.ne.s32.totalorder %s2320_s25, 0 }
 0x444   : > { %p2329_p10 = scmp.ge.s32.totalorder %s1534_s15, 2  ;;  %s1109_s27 = scalar_lea.sflag [#allocation6], %s1108_s22 }
 0x446   : > { %p1315_p6 = pnand %p2329_p10, %p2328_p9 }
 0x448   : > { %1517 = dma.done.wait (!%p1315_p6), %s1109_s27, 128  }
 0x449   : > { %1519 = vsyncadd (!%p1315_p6), %s1109_s27, 4294967168  ;;  %p20_p11 = scmp.ge.s32.totalorder %s1597_s18, 4   ;;  %s2330_s12 = smov %s1526_s13 }
 0x44a   : > { %s2331_s13 = smov %s1530_s14  ;;  %s2332_s14 = smov %s1609_s21 }
 0x44b   : > { %s2333_s15 = smov %s1597_s18  ;;  %22 = sbr.rel (!%p20_p11) target bundleno = 8 (0x8), region = 95 }
 0x452   :  { %1114 = vsyncpa [#allocation5], 1 }
 0x453   :  { %1116 = vsyncpa [#allocation5 + $0x1], 1 }
 0x454   :  { %1117 = vsyncpa [#allocation10], 1 }
 0x455   :  { %1119 = vsyncpa [#allocation10 + $0x1], 1 }
 0x456   :  { %1120 = vsyncpa [#allocation6], 1 }
 0x457   :  { %1122 = vsyncpa [#allocation6 + $0x1], 1 }
 0x458   :  { %1123 = vsyncpa [#allocation7], 1 }
 0x459   :  { %1125 = vsyncpa [#allocation7 + $0x1], 1 }

</bundles_post_ra>
